<compile_context>
chip_gen: v6e
topology: v6e:2x2x1
jax: 0.10.0
libtpu: 0.0.40
codegen_flags: <defaults>
</compile_context>

<pallas_src>
import functools

import jax
import jax.numpy as jnp
from jax.experimental import pallas as pl
from jax.experimental.pallas import tpu as pltpu


def _llama_hidden_dim(dim, hidden_dim, multiple_of, ffn_dim_multiplier):
    hidden_dim = int(2 * hidden_dim / 3)
    if ffn_dim_multiplier is not None:
        hidden_dim = int(ffn_dim_multiplier * hidden_dim)
    hidden_dim = multiple_of * ((hidden_dim + multiple_of - 1) // multiple_of)
    return hidden_dim


def _round_up(a, b):
    return ((a + b - 1) // b) * b


def _vmem_budget_bytes():
    """Usable VMEM budget: chip capacity minus headroom for Mosaic scratch."""
    cap = 64 << 20  # conservative fallback (v7x per-TC VMEM)
    try:
        info = pltpu.get_tpu_info()
        cap = int(getattr(info, "vmem_capacity_bytes", cap))
    except Exception:
        pass
    return max(32 << 20, cap - (16 << 20))


def fuse_up_weights(w1_t, w3_t, th=None, dtype=None):
    """Fuse w1^T / w3^T into a per-hidden-tile contiguous weight.

    Returns an array of shape (nh, dim, 2*th): block h holds the w1 tile in its
    first th columns and the w3 tile in its last th columns, so the kernel
    computes both up-projections with ONE contiguous MXU pass, and each tile is
    ONE contiguous HBM slab (large linear DMA).  th is recoverable from the
    shape, so feed_forward cannot be called with a mismatched th.
    One-time weight preparation; do it outside the hot path.
    """
    dim, hidden = w1_t.shape
    assert w3_t.shape == (dim, hidden)
    if dtype is not None:
        w1_t = w1_t.astype(dtype)
        w3_t = w3_t.astype(dtype)
    wb = jnp.dtype(w1_t.dtype).itemsize
    if th is None:
        # Keep the weights fully VMEM-resident when (double-buffered) they use
        # at most ~half the budget; otherwise stream the hidden axis in
        # 256-wide tiles (matches the 256-deep MXU on v6e/v7x, 2x v5e's 128).
        th = hidden if 2 * 3 * dim * hidden * wb <= _vmem_budget_bytes() // 2 else 256
    assert th % 128 == 0 and hidden % th == 0, "th must be a 128-multiple divisor of hidden"
    nh = hidden // th
    w1b = w1_t.reshape(dim, nh, th)
    w3b = w3_t.reshape(dim, nh, th)
    return jnp.concatenate([w1b, w3b], axis=-1).transpose(1, 0, 2)  # (nh, dim, 2*th)


def _pick_tm(m, dim, th, xb, wb, ob, budget, streamed):
    """Largest row tile fitting the VMEM budget; tm is what cuts weight traffic."""
    w_vmem = 2 * 3 * dim * th * wb                      # double-buffered w13 + w2 tiles
    if m <= 128:
        tm_cap = max(8, _round_up(m, 8))                # don't burn MXU work on garbage rows
    else:
        tm_cap = min(1024, _round_up(m, 128))
    tm = 8
    for cand in (1024, 512, 256, 128, 64, 32, 16, 8):
        if cand > tm_cap:
            continue
        act = 2 * cand * dim * (xb + ob)                # x + out, double-buffered
        acc = cand * dim * 4 if streamed else 0         # f32 accumulator
        if w_vmem + act + acc <= budget:
            tm = cand
            break
    if not streamed:
        # Weights resident -> splitting M is free; give v7x's 2nd TensorCore work.
        while tm > 128 and (m + tm - 1) // tm < 2 and m > 128:
            tm //= 2
    return tm


def _ffn_kernel_streamed(x_ref, w13_ref, w2_ref, o_ref, acc_ref, *, th):
    """Grid (M tiles, hidden tiles); weights streamed, f32 accumulator over h."""
    h = pl.program_id(1)

    x = x_ref[...]                                                       # (tm, dim)
    h13 = jnp.dot(x, w13_ref[...], preferred_element_type=jnp.float32)   # (tm, 2*th)
    h1 = h13[:, :th]
    h3 = h13[:, th:]
    gated = (h1 * jax.nn.sigmoid(h1)) * h3                               # SiLU gate in f32
    part = jnp.dot(gated.astype(w2_ref.dtype), w2_ref[...],
                   preferred_element_type=jnp.float32)                   # (tm, dim)

    @pl.when(h == 0)
    def _():
        acc_ref[...] = part

    @pl.when(h > 0)
    def _():
        acc_ref[...] += part

    @pl.when(h == pl.num_programs(1) - 1)
    def _():
        o_ref[...] = acc_ref[...].astype(o_ref.dtype)


def _ffn_kernel_resident(x_ref, w13_ref, w2_ref, o_ref, *, hidden):
    """Grid (M tiles,); full weights VMEM-resident, no accumulator."""
    x = x_ref[...]
    h13 = jnp.dot(x, w13_ref[...], preferred_element_type=jnp.float32)   # (tm, 2*hidden)
    h1 = h13[:, :hidden]
    h3 = h13[:, hidden:]
    gated = (h1 * jax.nn.sigmoid(h1)) * h3
    o_ref[...] = jnp.dot(gated.astype(w2_ref.dtype), w2_ref[...],
                         preferred_element_type=jnp.float32).astype(o_ref.dtype)


@functools.partial(jax.jit, static_argnames=("tm", "vmem_limit_bytes"))
def feed_forward(x, w13, w2_t, *, tm=None, vmem_limit_bytes=None):
    """SwiGLU FFN forward: w2( silu(w1(x)) * w3(x) ).

    x:    (batch, seq, dim)
    w13:  (nh, dim, 2*th)  -- from fuse_up_weights(w1_t, w3_t);  nh*th == hidden
    w2_t: (hidden, dim)    -- torch w2.weight transposed
    """
    batch, seq, dim = x.shape
    nh, dim_w, th2 = w13.shape
    assert th2 % 2 == 0
    th = th2 // 2
    hidden = nh * th
    assert dim_w == dim, "w13 dim mismatch"
    assert w2_t.shape == (hidden, dim), "w2 shape mismatch with fused w13"
    assert dim % 128 == 0, "dim must be lane-dense (multiple of 128)"
    assert th % 128 == 0

    x2d = x.reshape(batch * seq, dim)
    m = batch * seq

    xb = jnp.dtype(x.dtype).itemsize
    wb = jnp.dtype(w13.dtype).itemsize
    ob = xb
    streamed = nh > 1

    budget = _vmem_budget_bytes() if vmem_limit_bytes is None else int(vmem_limit_bytes)
    if tm is None:
        tm = _pick_tm(m, dim, th, xb, wb, ob, budget, streamed)
    assert tm % 8 == 0

    n_m = pl.cdiv(m, tm)
    weight_bytes = 3 * dim * hidden * wb
    cost = pl.CostEstimate(
        flops=6 * m * dim * hidden,                       # 2*M*d*2H (up) + 2*M*H*d (down)
        transcendentals=m * hidden,                       # sigmoid
        bytes_accessed=m * dim * (xb + ob)
        + (n_m * weight_bytes if streamed else weight_bytes),
    )
    cparams = pltpu.CompilerParams(
        dimension_semantics=("parallel", "arbitrary") if streamed else ("parallel",),
        vmem_limit_bytes=int(budget),
    )

    if streamed:
        out2d = pl.pallas_call(
            functools.partial(_ffn_kernel_streamed, th=th),
            out_shape=jax.ShapeDtypeStruct((m, dim), x.dtype),
            grid_spec=pltpu.PrefetchScalarGridSpec(
                num_scalar_prefetch=0,
                grid=(n_m, nh),
                in_specs=[
                    pl.BlockSpec((tm, dim), lambda i, h: (i, 0)),          # x (resident over h)
                    pl.BlockSpec((None, dim, 2 * th), lambda i, h: (h, 0, 0)),  # contiguous w13 tile
                    pl.BlockSpec((th, dim), lambda i, h: (h, 0)),          # w2 tile
                ],
                out_specs=pl.BlockSpec((tm, dim), lambda i, h: (i, 0)),
                scratch_shapes=[pltpu.VMEM((tm, dim), jnp.float32)],       # f32 accumulator
            ),
            compiler_params=cparams,
            cost_estimate=cost,
        )(x2d, w13, w2_t)
    else:
        out2d = pl.pallas_call(
            functools.partial(_ffn_kernel_resident, hidden=hidden),
            out_shape=jax.ShapeDtypeStruct((m, dim), x.dtype),
            grid_spec=pltpu.PrefetchScalarGridSpec(
                num_scalar_prefetch=0,
                grid=(n_m,),
                in_specs=[
                    pl.BlockSpec((tm, dim), lambda i: (i, 0)),
                    pl.BlockSpec((None, dim, 2 * hidden), lambda i: (0, 0, 0)),  # whole w13, DMA'd once
                    pl.BlockSpec((hidden, dim), lambda i: (0, 0)),               # whole w2, DMA'd once
                ],
                out_specs=pl.BlockSpec((tm, dim), lambda i: (i, 0)),
            ),
            compiler_params=cparams,
            cost_estimate=cost,
        )(x2d, w13, w2_t)

    return out2d.reshape(batch, seq, dim)


if __name__ == "__main__":
    # Small, kernel-friendly shapes: dim lane-dense (128), hidden a 256-multiple,
    # batch*seq deliberately NOT divisible by tm to exercise the ragged-M path.
    batch, seq, dim = 2, 120, 128
    multiple_of = 256
    ffn_dim_multiplier = None
    hidden = _llama_hidden_dim(dim, 4 * dim, multiple_of, ffn_dim_multiplier)  # -> 512

    key = jax.random.PRNGKey(0)
    kx, k1, k2, k3 = jax.random.split(key, 4)
    x = jax.random.normal(kx, (batch, seq, dim), dtype=jnp.float32)
    # torch Linear weight is (out, in); we store the transpose so the kernel does x @ W^T.
    w1_t = jax.random.normal(k1, (dim, hidden), dtype=jnp.float32) * 0.02
    w3_t = jax.random.normal(k3, (dim, hidden), dtype=jnp.float32) * 0.02
    w2_t = jax.random.normal(k2, (hidden, dim), dtype=jnp.float32) * 0.02

    # Full-precision reference.
    hp = jax.lax.Precision.HIGHEST
    r1 = jnp.einsum("bsd,dh->bsh", x, w1_t, precision=hp)
    r3 = jnp.einsum("bsd,dh->bsh", x, w3_t, precision=hp)
    ref = jnp.einsum("bsh,hd->bsd", (r1 * jax.nn.sigmoid(r1)) * r3, w2_t, precision=hp)

    # Path 1: f32 weights, streamed hidden axis (th=256 -> nh=2), explicit tm=128
    # so the grid has 2 ragged M tiles and the accumulator path is exercised.
    w13_f32 = fuse_up_weights(w1_t, w3_t, th=256)
    out_f32 = feed_forward(x, w13_f32, w2_t, tm=128)
    jax.block_until_ready(out_f32)
    assert out_f32.shape == (batch, seq, dim)
    err = float(jnp.max(jnp.abs(out_f32 - ref)))
    assert jnp.allclose(out_f32, ref, atol=5e-4, rtol=5e-3), err

    # Path 2: bf16 weights + activations (the recommended production config),
    # auto tiling -> weights fully VMEM-resident at this size, f32 accumulation.
    w13_bf = fuse_up_weights(w1_t, w3_t, dtype=jnp.bfloat16)
    out_bf = feed_forward(x.astype(jnp.bfloat16), w13_bf, w2_t.astype(jnp.bfloat16))
    jax.block_until_ready(out_bf)
    assert out_bf.shape == (batch, seq, dim)
    err_bf = float(jnp.max(jnp.abs(out_bf.astype(jnp.float32) - ref)))
    assert jnp.allclose(out_bf.astype(jnp.float32), ref, atol=3e-2, rtol=3e-2), err_bf

    print("KERNEL_OK")
</pallas_src>

<mosaic_0001>
module attributes {stable_mosaic.version = 11 : i64} {
  func.func @_ffn_kernel_streamed(%arg0: i32, %arg1: i32, %arg2: memref<128x128xf32, #tpu.memory_space<vmem>>, %arg3: memref<1x128x512xf32, #tpu.memory_space<vmem>>, %arg4: memref<256x128xf32, #tpu.memory_space<vmem>>, %arg5: memref<128x128xf32, #tpu.memory_space<vmem>>, %arg6: memref<128x128xf32, #tpu.memory_space<vmem>>) attributes {dimension_semantics = [#tpu.dimension_semantics<parallel>, #tpu.dimension_semantics<arbitrary>], iteration_bounds = array<i64: 2, 2>, scalar_prefetch = 0 : i64, scratch_operands = 1 : i64, tpu.core_type = #tpu.core_type<tc>, window_params = [{transform_indices = @transform_0, window_bounds = array<i64: 128, 128>}, {transform_indices = @transform_1, window_bounds = array<i64: 1, 128, 512>}, {transform_indices = @transform_2, window_bounds = array<i64: 256, 128>}, {transform_indices = @transform_3, window_bounds = array<i64: 128, 128>}]} {
    %c0 = arith.constant 0 : index
    %c0_0 = arith.constant 0 : index
    %0 = vector.load %arg2[%c0, %c0_0] : memref<128x128xf32, #tpu.memory_space<vmem>>, vector<128x128xf32>
    %c0_1 = arith.constant 0 : index
    %c0_2 = arith.constant 0 : index
    %c0_3 = arith.constant 0 : index
    %1 = vector.load %arg3[%c0_1, %c0_2, %c0_3] : memref<1x128x512xf32, #tpu.memory_space<vmem>>, vector<1x128x512xf32>
    %2 = vector.shape_cast %1 : vector<1x128x512xf32> to vector<128x512xf32>
    %cst = arith.constant dense<0.000000e+00> : vector<128x512xf32>
    %3 = tpu.matmul %0, %2, %cst {dimension_numbers = #tpu.dot_dimension_numbers<[1], [0], [0], [1], [0, 0, 1, 1], [], []>} : vector<128x128xf32>, vector<128x512xf32>, vector<128x512xf32> -> vector<128x512xf32>
    %4 = vector.extract_strided_slice %3 {offsets = [0, 0], sizes = [128, 256], strides = [1, 1]} : vector<128x512xf32> to vector<128x256xf32>
    %5 = vector.extract_strided_slice %3 {offsets = [0, 256], sizes = [128, 256], strides = [1, 1]} : vector<128x512xf32> to vector<128x256xf32>
    %6 = arith.negf %4 : vector<128x256xf32>
    %7 = math.exp %6 : vector<128x256xf32>
    %cst_4 = arith.constant 1.000000e+00 : f32
    %8 = vector.broadcast %cst_4 : f32 to vector<128x256xf32>
    %9 = arith.addf %8, %7 : vector<128x256xf32>
    %10 = arith.divf %8, %9 : vector<128x256xf32>
    %11 = arith.mulf %4, %10 : vector<128x256xf32>
    %12 = arith.mulf %11, %5 : vector<128x256xf32>
    %c0_5 = arith.constant 0 : index
    %c0_6 = arith.constant 0 : index
    %13 = vector.load %arg4[%c0_5, %c0_6] : memref<256x128xf32, #tpu.memory_space<vmem>>, vector<256x128xf32>
    %cst_7 = arith.constant dense<0.000000e+00> : vector<128x128xf32>
    %14 = tpu.matmul %12, %13, %cst_7 {dimension_numbers = #tpu.dot_dimension_numbers<[1], [0], [0], [1], [0, 0, 1, 1], [], []>} : vector<128x256xf32>, vector<256x128xf32>, vector<128x128xf32> -> vector<128x128xf32>
    %c0_i32 = arith.constant 0 : i32
    %15 = arith.cmpi eq, %arg1, %c0_i32 : i32
    %16 = arith.extui %15 : i1 to i32
    %c0_i32_8 = arith.constant 0 : i32
    %17 = arith.cmpi ne, %16, %c0_i32_8 : i32
    scf.if %17 {
      %c0_12 = arith.constant 0 : index
      %c0_13 = arith.constant 0 : index
      %24 = vector.load %arg6[%c0_12, %c0_13] : memref<128x128xf32, #tpu.memory_space<vmem>>, vector<128x128xf32>
      tpu.vector_store %arg6[%c0_12, %c0_13], %14 {strides = array<i32>} : memref<128x128xf32, #tpu.memory_space<vmem>>, vector<128x128xf32>,
    } else {
    }
    %c0_i32_9 = arith.constant 0 : i32
    %18 = arith.cmpi sgt, %arg1, %c0_i32_9 : i32
    %19 = arith.extui %18 : i1 to i32
    %c0_i32_10 = arith.constant 0 : i32
    %20 = arith.cmpi ne, %19, %c0_i32_10 : i32
    scf.if %20 {
      %c0_12 = arith.constant 0 : index
      %c0_13 = arith.constant 0 : index
      %24 = vector.load %arg6[%c0_12, %c0_13] : memref<128x128xf32, #tpu.memory_space<vmem>>, vector<128x128xf32>
      %25 = arith.addf %24, %14 : vector<128x128xf32>
      %c0_14 = arith.constant 0 : index
      %c0_15 = arith.constant 0 : index
      %26 = vector.load %arg6[%c0_14, %c0_15] : memref<128x128xf32, #tpu.memory_space<vmem>>, vector<128x128xf32>
      tpu.vector_store %arg6[%c0_14, %c0_15], %25 {strides = array<i32>} : memref<128x128xf32, #tpu.memory_space<vmem>>, vector<128x128xf32>,
    } else {
    }
    %c1_i32 = arith.constant 1 : i32
    %21 = arith.cmpi eq, %arg1, %c1_i32 : i32
    %22 = arith.extui %21 : i1 to i32
    %c0_i32_11 = arith.constant 0 : i32
    %23 = arith.cmpi ne, %22, %c0_i32_11 : i32
    scf.if %23 {
      %c0_12 = arith.constant 0 : index
      %c0_13 = arith.constant 0 : index
      %24 = vector.load %arg6[%c0_12, %c0_13] : memref<128x128xf32, #tpu.memory_space<vmem>>, vector<128x128xf32>
      %c0_14 = arith.constant 0 : index
      %c0_15 = arith.constant 0 : index
      %25 = vector.load %arg5[%c0_14, %c0_15] : memref<128x128xf32, #tpu.memory_space<vmem>>, vector<128x128xf32>
      tpu.vector_store %arg5[%c0_14, %c0_15], %24 {strides = array<i32>} : memref<128x128xf32, #tpu.memory_space<vmem>>, vector<128x128xf32>,
    } else {
    }
    return
  }
  func.func @transform_0(%arg0: i32, %arg1: i32) -> (i32, i32) {
    %c0_i32 = arith.constant 0 : i32
    %c0_i32_0 = arith.constant 0 : i32
    return %arg0, %c0_i32 : i32, i32
  }
  func.func @transform_1(%arg0: i32, %arg1: i32) -> (i32, i32, i32) {
    %c0_i32 = arith.constant 0 : i32
    %c0_i32_0 = arith.constant 0 : i32
    %c0_i32_1 = arith.constant 0 : i32
    return %arg1, %c0_i32, %c0_i32_0 : i32, i32, i32
  }
  func.func @transform_2(%arg0: i32, %arg1: i32) -> (i32, i32) {
    %c0_i32 = arith.constant 0 : i32
    %c0_i32_0 = arith.constant 0 : i32
    return %arg1, %c0_i32 : i32, i32
  }
  func.func @transform_3(%arg0: i32, %arg1: i32) -> (i32, i32) {
    %c0_i32 = arith.constant 0 : i32
    %c0_i32_0 = arith.constant 0 : i32
    return %arg0, %c0_i32 : i32, i32
  }
}

</mosaic_0001>

<bundles_post_ra>
// kernel: feed_forward.1
= control target key start
LH: loop header
LB: loop body
LE: loop exit
PB: predicated region body
PF: predicated region fallthrough
CT: control target
= control target key end

     0   :  { %s2795_s0 = inlined_call_operand.hbm [shape: f32[240,128], index: 0, kind: input, shape index: {}]   ;;  %s2796_s1 = inlined_call_operand.hbm [shape: f32[2,128,512], index: 1, kind: input, shape index: {}]   ;;  %s2797_s2 = inlined_call_operand.hbm [shape: f32[512,128], index: 2, kind: input, shape index: {}]   ;;  %s2798_s3 = inlined_call_operand.hbm [shape: f32[240,128], index: 3, kind: output, shape index: {}]  }
   0x1   :  { %2807 = sst [smem:[#allocation21_spill]] %s2795_s0 }
   0x2   :  { %2808 = sst [smem:[#allocation22_spill]] %s2798_s3 }
   0x3   :  { %8 = vsyncpa [#allocation4], 0 }
   0x4   :  { %10 = vsyncpa [#allocation4 + $0x1], 0 }
   0x5   :  { %11 = vsyncpa [#allocation7], 0 }
   0x6   :  { %13 = vsyncpa [#allocation7 + $0x1], 0 }
   0x7   :  { %14 = vsyncpa [#allocation5], 0 }
   0x8   :  { %16 = vsyncpa [#allocation5 + $0x1], 0  ;;  %s2040_s12 = smov 0   ;;  %s2042_s13 = smov 0  }
   0x9   :  { %s2044_s14 = smov 0   ;;  %s2046_s15 = smov 0  }
   0xa   :  { %s2048_s16 = smov 0   ;;  %s2050_s17 = smov 0  }
   0xb   :  { %s2052_s18 = smov 0   ;;  %s2054_s19 = smov 0  }
   0xc   :  { %s2056_s20 = smov 0   ;;  %s2058_s21 = smov 0  }
   0xd   :  { %s2060_s22 = smov 0  }
   0xe LB: > { %2809 = sst [smem:[#allocation13_spill]] %s1977_s15  ;;  %s2096_s23 = sadd.s32 4294967295, %s2005_s22   ;;  %s2005_s22 = sphi %s2060_s22, %s22_s22   ;;  %s2001_s21 = sphi %s2058_s21, %s2835_s21   ;;  %s1997_s20 = sphi %s2056_s20, %s2842_s20   ;;  %s1993_s19 = sphi %s2054_s19, %s2833_s19   ;;  %s1989_s18 = sphi %s2052_s18, %s2841_s18   ;;  %s1985_s17 = sphi %s2050_s17, %s2832_s17   ;;  %s1981_s16 = sphi %s2048_s16, %s2840_s16   ;;  %s1977_s15 = sphi %s2046_s15, %s2839_s15   ;;  %s1973_s14 = sphi %s2044_s14, %s2838_s14   ;;  %s1969_s13 = sphi %s2042_s13, %s2837_s13   ;;  %s1965_s12 = sphi %s2040_s12, %s2836_s12  }
   0xf   : > { %2810 = sst [smem:[#allocation14_spill]] %s1985_s17  ;;  %s1386_s24 = sadd.s32 4294967294, %s2005_s22  }
  0x10   : > { %2811 = sst [smem:[#allocation15_spill]] %s2001_s21  ;;  %s31_s25 = sadd.s32 1, %s1997_s20 }
  0x11   : > { %s34_s26 = sadd.s32 1, %s2001_s21  ;;  %p32_p0 = scmp.ge.s32.totalorder %s31_s25, 2 }
  0x12   : > { %s41_s27 = sadd.s32 1, %s1985_s17  ;;  %p48_p1 = scmp.ne.s32.totalorder %s1985_s17, %s1981_s16 }
  0x13   : > { %p49_p2 = scmp.eq.s32.totalorder %s2005_s22, 0  ;;  %s2844_s25 = smov (%p32_p0, %s31_s25), 0 }
  0x14   : > { %2812 = sst [smem:[#allocation16_spill]] %s2844_s25  ;;  %s2846_s26 = smov (!%p32_p0, %s34_s26), %s2001_s21 }
  0x15   : > { %p2113_p3 = por %p49_p2, %p48_p1  ;;  %p2799_p4 = scmp.ne.s32.totalorder %s1981_s16, %s1977_s15 }
  0x16   : > { %p36_p5 = scmp.ge.s32.totalorder %s2846_s26, 2  ;;  %p55_p6 = scmp.eq.s32.totalorder %s2096_s23, 0 }
  0x17   : > { %s64_s29 = ssub.s32 %s1997_s20, %s2844_s25  ;;  %s67_s30 = sadd.s32 1, %s1973_s14 }
  0x18   : > { %s2848_s26 = smov (%p36_p5, %s2846_s26), 0  ;;  %p2130_p7 = por %p55_p6, %p2799_p4 }
  0x19   : > { %2814 = sst [smem:[#allocation17_spill]] %s2848_s26  ;;  %p65_p8 = scmp.eq.s32.totalorder %s64_s29, 0 }
  0x1a   : > { %s38_s5 = ssub.s32 %s2001_s21, %s2848_s26  ;;  %p74_p9 = scmp.ne.s32.totalorder %s1973_s14, %s1969_s13 }
  0x1b   : > { %p39_p10 = scmp.eq.s32.totalorder %s38_s5, 0  ;;  %p80_p11 = scmp.ne.s32.totalorder %s1969_s13, %s1965_s12 }
  0x1c   : > { %s2141_s6 = scalar_select %p65_p8, %s1973_s14, %s67_s30  }
  0x1d   : > { %s2144_s7 = scalar_select %p39_p10, %s1985_s17, %s41_s27  }
  0x1e   : > { %2816 = sst [smem:[#allocation18_spill]] %s2141_s6  ;;  %p2148_p12 = por %p74_p9, %p49_p2 }
  0x1f   : > { %2817 = sst [smem:[#allocation19_spill]] %s2144_s7  ;;  %p2154_p13 = por %p80_p11, %p55_p6 }
  0x20   : > { %p130_p0 = scmp.eq.s32.totalorder %s2096_s23, 3  ;;  %p136_p5 = scmp.eq.s32.totalorder %s1386_s24, 3 }
  0x21   : > { %p2821_p8 = scmp.ne.s32.totalorder %s1981_s16, %s1977_s15  ;;  %p1388_p2 = scmp.ge.s32.totalorder %s2005_s22, 4 }
  0x22   : > { %p2162_p4 = por %p130_p0, %p48_p1 }
  0x23   : > { %p2169_p10 = por %p136_p5, %p2821_p8  ;;  %152 = sbr.rel (%p1388_p2) target bundleno = 109 (0x6d), region = 16 }
  0x24   : > { %s2820_s10 = scalar_select %p2162_p4, 1, 0 }
  0x25   : > { %s2822_s11 = scalar_select %p2169_p10, 1, 0 }
  0x27   : > { %2823 = sst [smem:[#allocation20_spill]] %s2822_s11 }
  0x28   : > { %155 = sbr.rel (!%p2113_p3) target bundleno = 78 (0x4e), region = 20  ;;  %s156_s12 = sand.u32 (%p2113_p3), 1, %s1985_s17  }
  0x29   : > { %s1390_s24 = sshll.u32 (%p2113_p3), %s2001_s21, 4  ;;  %s1389_s27 = sshll.u32 (%p2113_p3), %s156_s12, 7 }
  0x2a   : > { %s162_s29 = ssub.s32 (%p2113_p3), 30, %s1390_s24  ;;  %s2181_s26 = scalar_lea.sflag (%p2113_p3), [#allocation4], %s156_s12 }
  0x2b   : > { %p163_p1 = scmp.lt.s32.totalorder (%p2113_p3), %s162_s29, 16  ;;  %s160_s25 = scalar_lea.vmem (%p2113_p3), [#allocation3], %s1389_s27 }
  0x2d   : > { %s2850_s29 = smov (!%p163_p1, %s162_s29), 16 }
  0x2e   : > { %s2178_s30 = sshll.u32 %s2850_s29, 7 }
  0x2f   : > { %s167_s5 = ssub.s32 2048, %s2178_s30 }
  0x30   : > { %168 = vsyncadd %s2181_s26, %s167_s5  ;;  %p1392_p3 = scmp.ne.s32.totalorder %s2178_s30, 0  ;;  %s1451_s28 = sshll.u32 %s2001_s21, 11 }
  0x31   : > { %s2824_s0 = sld [smem:[#allocation21_spill]]  ;;  %s173_s29 = sshll.u32 %s160_s25, 4  ;;  %s2191_s29 = int_to_ptr.vmem [resolvable:$true] %s173_s29 }
  0x37   : > { %s2189_s24 = scalar_lea.hbm %s2824_s0, %s1451_s28  ;;  %s1807_s6 = scalar_lea.hbm %s2824_s0, 3840 }
  0x38   : > { %s1803_s12 = scalar_lea.hbm %s2189_s24, %s2178_s30 }
  0x39   : > { %p1804_p6 = scmp.ne.s32.totalorder %s2189_s24, %s1803_s12  ;;  %p1809_p0 = scmp.lt.s32.totalorder %s1807_s6, %s1803_s12 }
  0x3b   : > { %p1805_p9 = pnand %p1804_p6, %p1392_p3 }
  0x3d   : > { %p1806_p11 = pneg %p1805_p9 }
  0x3f   : > { %p1811_p5 = pnand %p1809_p0, %p1806_p11 }
  0x41   : > { %1814 = shalt.err (!%p1811_p5)
}
  0x42   : > { %s1815_s17 = scalar_lea.vmem %s2191_s29, %s2178_s30  ;;  %s2007_s25 = smov [#allocation3]  }
  0x43   : > { %p1816_p8 = scmp.ne.s32.totalorder %s2191_s29, %s1815_s17  ;;  %s1819_s7 = sshll.u32 %s2007_s25, 4  ;;  %s1820_s7 = int_to_ptr.vmem [resolvable:$false] %s1819_s7 }
  0x44   : > { %s1821_s28 = scalar_lea.vmem %s1820_s7, 4096  ;;  %p1822_p6 = scmp.lt.s32.totalorder %s2191_s29, %s1820_s7 }
  0x45   : > { %p1817_p2 = pnand %p1816_p8, %p1392_p3  ;;  %p1823_p9 = scmp.lt.s32.totalorder %s1821_s28, %s1815_s17 }
  0x47   : > { %p1818_p1 = pneg %p1817_p2  ;;  %p1824_p10 = por %p1823_p9, %p1822_p6 }
  0x49   : > { %p1825_p4 = pnand %p1824_p10, %p1818_p1 }
  0x4b   : > { %1828 = shalt.err (!%p1825_p4)
}
  0x4c   : > { %s2008_s6 = smov 128   ;;  %s2009_s12 = smov 8  }
  0x4d   : > { %179 = dma.hbm_to_vmem [thread:$0]  (%p1392_p3), %s2189_s24, %s2178_s30, %s2191_s29, %s2181_s26, %s2008_s6, %s2008_s6, %s2009_s12  }
  0x4e PF: > { %s183_s27 = sand.u32 1, %s2005_s22   ;;  %s185_s5 = sand.u32 1, %s1973_s14  }
  0x4f   : > { %s1396_s17 = sshll.u32 %s185_s5, 9  ;;  %s1452_s25 = sshll.u32 %s1997_s20, 13 }
  0x50   : > { %s193_s0 = scalar_lea.hbm %s2796_s1, %s1452_s25  ;;  %s187_s21 = scalar_lea.vmem [#allocation6], %s1396_s17 }
  0x51   : > { %s194_s11 = sshll.u32 %s187_s21, 4  ;;  %s1399_s15 = sshll.u32 %s185_s5, 8  ;;  %s195_s11 = int_to_ptr.vmem [resolvable:$true] %s194_s11 }
  0x52   : > { %s2219_s3 = scalar_lea.sflag [#allocation7], %s183_s27  ;;  %s1841_s26 = scalar_lea.vmem %s195_s11, 8192 }
  0x53   : > { %p1842_p4 = scmp.ne.s32.totalorder %s195_s11, %s1841_s26  ;;  %s2010_s30 = smov [#allocation6]  }
  0x54   : > { %s1845_s24 = sshll.u32 %s2010_s30, 4  ;;  %s1846_s24 = int_to_ptr.vmem [resolvable:$false] %s1845_s24 }
  0x55   : > { %p1843_p10 = pnand %p1842_p4, %p2148_p12  ;;  %s1847_s29 = scalar_lea.vmem %s1846_s24, 16384 }
  0x56   : > { %p1848_p11 = scmp.lt.s32.totalorder %s195_s11, %s1846_s24  ;;  %p1849_p0 = scmp.lt.s32.totalorder %s1847_s29, %s1841_s26 }
  0x57   : > { %p1844_p3 = pneg %p1843_p10 }
  0x58   : > { %p1850_p5 = por %p1849_p0, %p1848_p11 }
  0x5a   : > { %p1851_p8 = pnand %p1850_p5, %p1844_p3 }
  0x5c   : > { %1854 = shalt.err (!%p1851_p8)
}
  0x5d   : > { %s2011_s6 = smov 512   ;;  %s2012_s21 = smov 32  }
  0x5e   : > { %1567 = dma.hbm_to_vmem [thread:$0]  (%p2148_p12), %s193_s0, 8192, %s195_s11, %s2219_s3, %s2011_s6, %s2011_s6, %s2012_s21  }
  0x5f   : > { %s1453_s12 = sshll.u32 %s1997_s20, 12  ;;  %s208_s25 = scalar_lea.vmem [#allocation8], %s1399_s15 }
  0x60   : > { %s214_s17 = scalar_lea.hbm %s2797_s2, %s1453_s12  ;;  %s215_s7 = sshll.u32 %s208_s25, 4  ;;  %s216_s7 = int_to_ptr.vmem [resolvable:$true] %s215_s7 }
  0x61   : > { %s1867_s28 = scalar_lea.vmem %s216_s7, 4096  ;;  %s2013_s26 = smov [#allocation8]  }
  0x62   : > { %p1868_p2 = scmp.ne.s32.totalorder %s216_s7, %s1867_s28  ;;  %s1871_s30 = sshll.u32 %s2013_s26, 4  ;;  %s1872_s30 = int_to_ptr.vmem [resolvable:$false] %s1871_s30 }
  0x63   : > { %s1873_s24 = scalar_lea.vmem %s1872_s30, 8192  ;;  %p1874_p9 = scmp.lt.s32.totalorder %s216_s7, %s1872_s30 }
  0x64   : > { %p1869_p1 = pnand %p1868_p2, %p2148_p12  ;;  %p1875_p4 = scmp.lt.s32.totalorder %s1873_s24, %s1867_s28 }
  0x66   : > { %p1870_p6 = pneg %p1869_p1  ;;  %p1876_p10 = por %p1875_p4, %p1874_p9 }
  0x68   : > { %p1877_p3 = pnand %p1876_p10, %p1870_p6 }
  0x6a   : > { %1880 = shalt.err (!%p1877_p3)
}
  0x6b   : > { %s2014_s0 = smov 128   ;;  %s2015_s15 = smov 8  }
  0x6c   : > { %1568 = dma.hbm_to_vmem [thread:$0]  (%p2148_p12), %s214_s17, 4096, %s216_s7, %s2219_s3, %s2014_s0, %s2014_s0, %s2015_s15  }
  0x6d PF: > { %p1402_p11 = scmp.ge.s32.totalorder %s2005_s22, 1  ;;  %p223_p0 = scmp.lt.s32.totalorder %s2005_s22, 5 }
  0x6f   : > { %p224_p5 = pnand %p1402_p11, %p223_p0 }
  0x70   : > { %s2238_s11 = sand.u32 (!%p224_p5), 1, %s1981_s16  }
  0x71   : > { %227 = sbr.rel (%p224_p5) target bundleno = 737 (0x2e1), region = 32  ;;  %s1403_s29 = sshll.u32 (!%p224_p5), %s2238_s11, 7 }
  0x72   : > { %s230_s6 = scalar_lea.sflag (!%p224_p5), [#allocation4], %s2238_s11  ;;  %s2244_s21 = scalar_lea.vmem (!%p224_p5), [#allocation3], %s1403_s29 }
  0x76   : > { %1952 = dma.done.wait (%p2130_p7), %s230_s6, 2048  }
  0x77   : > { %1954 = vsyncadd (%p2130_p7), %s230_s6, 4294965248  ;;  %s238_s3 = sand.u32 1, %s2096_s23   ;;  %s240_s8 = sand.u32 1, %s1969_s13  }
  0x78   : > { %s1404_s12 = sshll.u32 %s240_s8, 9  ;;  %s239_s27 = scalar_lea.sflag [#allocation7], %s238_s3 }
  0x79   : > { %s2254_s5 = scalar_lea.vmem [#allocation6], %s1404_s12 }
  0x7a   : > { %1956 = dma.done.wait (%p2154_p13), %s239_s27, 12288  }
  0x7b   : > { %1958 = vsyncadd (%p2154_p13), %s239_s27, 4294955008  ;;  %v2016_v0 = vmov 0.0   ;;  %v372_v1 = vld [vmem:[%s2254_s5 + $0x1e8] sm:$0xff]  ;;  %v371_v2 = vld [vmem:[%s2254_s5 + $0x1e0] sm:$0xff]  ;;  %s1405_s23 = sshll.u32 %s240_s8, 8  ;;  %s2661_s9 = scalar_lea.vmem [#allocation9], %s1403_s29 }
  0x7c   : > { %439 = vmatprep.mubr.f32.mxu0 %v2016_v0  ;;  %487 = vmatprep.mubr.f32.mxu1 %v2016_v0  ;;  %v368_v3 = vld [vmem:[%s2254_s5 + $0x1c8] sm:$0xff]  ;;  %v367_v4 = vld [vmem:[%s2254_s5 + $0x1c0] sm:$0xff]  ;;  %v374_v35 = vld [vmem:[%s2254_s5 + $0x1f8] sm:$0xff]  ;;  %s2415_s4 = scalar_lea.vmem [#allocation8], %s1405_s23  ;;  %p1439_p7 = scmp.ne.s32.totalorder %s1989_s18, 0 }
  0x7d   : > { %375 = vmatprep.subr.mxu0 %v372_v1  ;;  %1535 = vmatprep.subr.mxu1 %v372_v1  ;;  %v364_v5 = vld [vmem:[%s2254_s5 + $0x1a8] sm:$0xff]  ;;  %v363_v6 = vld [vmem:[%s2254_s5 + $0x1a0] sm:$0xff]  ;;  %v373_v36 = vld [vmem:[%s2254_s5 + $0x1f0] sm:$0xff] }
  0x7e   : > { %376 = vmatpush1.msra.mxu0 %v371_v2  ;;  %1551 = vmatpush1.msra.mxu1 %v371_v2  ;;  %v360_v7 = vld [vmem:[%s2254_s5 + $0x188] sm:$0xff]  ;;  %v359_v8 = vld [vmem:[%s2254_s5 + $0x180] sm:$0xff]  ;;  %v370_v37 = vld [vmem:[%s2254_s5 + $0x1d8] sm:$0xff] }
  0x7f   : > { %377 = vmatprep.subr.mxu0 %v368_v3  ;;  %1536 = vmatprep.subr.mxu1 %v368_v3  ;;  %v356_v9 = vld [vmem:[%s2254_s5 + $0x168] sm:$0xff]  ;;  %v355_v10 = vld [vmem:[%s2254_s5 + $0x160] sm:$0xff]  ;;  %v369_v38 = vld [vmem:[%s2254_s5 + $0x1d0] sm:$0xff] }
  0x80   : > { %378 = vmatpush1.msra.mxu0 %v367_v4  ;;  %1552 = vmatpush1.msra.mxu1 %v367_v4  ;;  %v352_v11 = vld [vmem:[%s2254_s5 + $0x148] sm:$0xff]  ;;  %v351_v12 = vld [vmem:[%s2254_s5 + $0x140] sm:$0xff]  ;;  %v366_v41 = vld [vmem:[%s2254_s5 + $0x1b8] sm:$0xff] }
  0x81   : > { %379 = vmatprep.subr.mxu0 %v364_v5  ;;  %1537 = vmatprep.subr.mxu1 %v364_v5  ;;  %v348_v13 = vld [vmem:[%s2254_s5 + $0x128] sm:$0xff]  ;;  %v347_v14 = vld [vmem:[%s2254_s5 + $0x120] sm:$0xff]  ;;  %v365_v42 = vld [vmem:[%s2254_s5 + $0x1b0] sm:$0xff] }
  0x82   : > { %380 = vmatpush1.msra.mxu0 %v363_v6  ;;  %1553 = vmatpush1.msra.mxu1 %v363_v6  ;;  %v344_v15 = vld [vmem:[%s2254_s5 + $0x108] sm:$0xff]  ;;  %v343_v16 = vld [vmem:[%s2254_s5 + $0x100] sm:$0xff]  ;;  %v362_v43 = vld [vmem:[%s2254_s5 + $0x198] sm:$0xff] }
  0x83   : > { %381 = vmatprep.subr.mxu0 %v360_v7  ;;  %1538 = vmatprep.subr.mxu1 %v360_v7  ;;  %v340_v17 = vld [vmem:[%s2254_s5 + $0xe8] sm:$0xff]  ;;  %v339_v18 = vld [vmem:[%s2254_s5 + $0xe0] sm:$0xff]  ;;  %v361_v44 = vld [vmem:[%s2254_s5 + $0x190] sm:$0xff] }
  0x84   : > { %382 = vmatpush1.msra.mxu0 %v359_v8  ;;  %1554 = vmatpush1.msra.mxu1 %v359_v8  ;;  %v336_v19 = vld [vmem:[%s2254_s5 + $0xc8] sm:$0xff]  ;;  %v335_v20 = vld [vmem:[%s2254_s5 + $0xc0] sm:$0xff]  ;;  %v2321_v45 = vld [vmem:[%s2244_s21 + $0x10] sm:$0xff] }
  0x85   : > { %383 = vmatprep.subr.mxu0 %v356_v9  ;;  %1539 = vmatprep.subr.mxu1 %v356_v9  ;;  %v332_v21 = vld [vmem:[%s2254_s5 + $0xa8] sm:$0xff]  ;;  %v331_v22 = vld [vmem:[%s2254_s5 + $0xa0] sm:$0xff]  ;;  %v2325_v46 = vld [vmem:[%s2244_s21 + $0x50] sm:$0xff] }
  0x86   : > { %384 = vmatpush1.msra.mxu0 %v355_v10  ;;  %1555 = vmatpush1.msra.mxu1 %v355_v10  ;;  %v328_v23 = vld [vmem:[%s2254_s5 + $0x88] sm:$0xff]  ;;  %v327_v24 = vld [vmem:[%s2254_s5 + $0x80] sm:$0xff]  ;;  %v358_v47 = vld [vmem:[%s2254_s5 + $0x178] sm:$0xff] }
  0x87   : > { %385 = vmatprep.subr.mxu0 %v352_v11  ;;  %1540 = vmatprep.subr.mxu1 %v352_v11  ;;  %v324_v25 = vld [vmem:[%s2254_s5 + $0x68] sm:$0xff]  ;;  %v323_v26 = vld [vmem:[%s2254_s5 + $0x60] sm:$0xff]  ;;  %v357_v48 = vld [vmem:[%s2254_s5 + $0x170] sm:$0xff] }
  0x88   : > { %386 = vmatpush1.msra.mxu0 %v351_v12  ;;  %1556 = vmatpush1.msra.mxu1 %v351_v12  ;;  %v320_v27 = vld [vmem:[%s2254_s5 + $0x48] sm:$0xff]  ;;  %v319_v28 = vld [vmem:[%s2254_s5 + $0x40] sm:$0xff]  ;;  %v354_v49 = vld [vmem:[%s2254_s5 + $0x158] sm:$0xff] }
  0x89   : > { %387 = vmatprep.subr.mxu0 %v348_v13  ;;  %1541 = vmatprep.subr.mxu1 %v348_v13  ;;  %v316_v29 = vld [vmem:[%s2254_s5 + $0x28] sm:$0xff]  ;;  %v315_v30 = vld [vmem:[%s2254_s5 + $0x20] sm:$0xff]  ;;  %v353_v50 = vld [vmem:[%s2254_s5 + $0x150] sm:$0xff] }
  0x8a   : > { %388 = vmatpush1.msra.mxu0 %v347_v14  ;;  %1557 = vmatpush1.msra.mxu1 %v347_v14  ;;  %v312_v31 = vld [vmem:[%s2254_s5 + $0x8] sm:$0xff]  ;;  %v311_v32 = vld [vmem:[%s2254_s5] sm:$0xff]  ;;  %v2335_v51 = vld [vmem:[%s2244_s21 + $0x18] sm:$0xff] }
  0x8b   : > { %389 = vmatprep.subr.mxu0 %v344_v15  ;;  %1542 = vmatprep.subr.mxu1 %v344_v15  ;;  %v2295_v33 = vld [vmem:[%s2244_s21] sm:$0xff]  ;;  %v2308_v39 = vld [vmem:[%s2244_s21 + $0x8] sm:$0xff]  ;;  %v2339_v52 = vld [vmem:[%s2244_s21 + $0x58] sm:$0xff] }
  0x8c   : > { %390 = vmatpush1.msra.mxu0 %v343_v16  ;;  %1558 = vmatpush1.msra.mxu1 %v343_v16  ;;  %v2298_v34 = vld [vmem:[%s2244_s21 + $0x40] sm:$0xff]  ;;  %v2312_v40 = vld [vmem:[%s2244_s21 + $0x48] sm:$0xff]  ;;  %v350_v53 = vld [vmem:[%s2254_s5 + $0x138] sm:$0xff] }
  0x8d   : > { %391 = vmatprep.subr.mxu0 %v340_v17  ;;  %1543 = vmatprep.subr.mxu1 %v340_v17  ;;  %v349_v54 = vld [vmem:[%s2254_s5 + $0x130] sm:$0xff]  ;;  %v346_v55 = vld [vmem:[%s2254_s5 + $0x118] sm:$0xff]  ;;  %v2349_v57 = vld [vmem:[%s2244_s21 + $0x20] sm:$0xff] }
  0x8e   : > { %392 = vmatpush1.msra.mxu0 %v339_v18  ;;  %1559 = vmatpush1.msra.mxu1 %v339_v18  ;;  %v345_v56 = vld [vmem:[%s2254_s5 + $0x110] sm:$0xff]  ;;  %v2353_v58 = vld [vmem:[%s2244_s21 + $0x60] sm:$0xff]  ;;  %v342_v59 = vld [vmem:[%s2254_s5 + $0xf8] sm:$0xff] }
  0x8f   : > { %393 = vmatprep.subr.mxu0 %v336_v19  ;;  %1544 = vmatprep.subr.mxu1 %v336_v19  ;;  %v341_v60 = vld [vmem:[%s2254_s5 + $0xf0] sm:$0xff]  ;;  %v338_v61 = vld [vmem:[%s2254_s5 + $0xd8] sm:$0xff]  ;;  %v300_v63 = vld [vmem:[%s2244_s21 + $0x28] sm:$0xff] }
  0x90   : > { %394 = vmatpush1.msra.mxu0 %v335_v20  ;;  %1560 = vmatpush1.msra.mxu1 %v335_v20  ;;  %v337_v62 = vld [vmem:[%s2254_s5 + $0xd0] sm:$0xff]  ;;  %v2365_v1 = vld [vmem:[%s2244_s21 + $0x68] sm:$0xff]  ;;  %v334_v2 = vld [vmem:[%s2254_s5 + $0xb8] sm:$0xff] }
  0x91   : > { %395 = vmatprep.subr.mxu0 %v332_v21  ;;  %1545 = vmatprep.subr.mxu1 %v332_v21  ;;  %v333_v3 = vld [vmem:[%s2254_s5 + $0xb0] sm:$0xff]  ;;  %v330_v4 = vld [vmem:[%s2254_s5 + $0x98] sm:$0xff] }
  0x92   : > { %396 = vmatpush1.msra.mxu0 %v331_v22  ;;  %1561 = vmatpush1.msra.mxu1 %v331_v22  ;;  %v329_v5 = vld [vmem:[%s2254_s5 + $0x90] sm:$0xff]  ;;  %v326_v8 = vld [vmem:[%s2254_s5 + $0x78] sm:$0xff]  ;;  %v982_v22 = vld [vmem:[%s2415_s4 + $0xe8] sm:$0xff] }
  0x93   : > { %397 = vmatprep.subr.mxu0 %v328_v23  ;;  %1546 = vmatprep.subr.mxu1 %v328_v23  ;;  %v301_v6 = vld [vmem:[%s2244_s21 + $0x30] sm:$0xff]  ;;  %v322_v10 = vld [vmem:[%s2254_s5 + $0x58] sm:$0xff]  ;;  %v966_v23 = vld [vmem:[%s2415_s4 + $0x68] sm:$0xff] }
  0x94   : > { %398 = vmatpush1.msra.mxu0 %v327_v24  ;;  %1562 = vmatpush1.msra.mxu1 %v327_v24  ;;  %v2376_v7 = vld [vmem:[%s2244_s21 + $0x70] sm:$0xff]  ;;  %v302_v12 = vld [vmem:[%s2244_s21 + $0x38] sm:$0xff]  ;;  %v981_v24 = vld [vmem:[%s2415_s4 + $0xe0] sm:$0xff] }
  0x95   : > { %399 = vmatprep.subr.mxu0 %v324_v25  ;;  %1547 = vmatprep.subr.mxu1 %v324_v25  ;;  %v325_v9 = vld [vmem:[%s2254_s5 + $0x70] sm:$0xff]  ;;  %v2387_v13 = vld [vmem:[%s2244_s21 + $0x78] sm:$0xff]  ;;  %v965_v25 = vld [vmem:[%s2415_s4 + $0x60] sm:$0xff] }
  0x96   : > { %400 = vmatpush1.msra.mxu0 %v323_v26  ;;  %1563 = vmatpush1.msra.mxu1 %v323_v26  ;;  %v321_v11 = vld [vmem:[%s2254_s5 + $0x50] sm:$0xff]  ;;  %v318_v14 = vld [vmem:[%s2254_s5 + $0x38] sm:$0xff] }
  0x97   : > { %401 = vmatprep.subr.mxu0 %v320_v27  ;;  %1548 = vmatprep.subr.mxu1 %v320_v27  ;;  %v317_v15 = vld [vmem:[%s2254_s5 + $0x30] sm:$0xff]  ;;  %v314_v16 = vld [vmem:[%s2254_s5 + $0x18] sm:$0xff] }
  0x98   : > { %402 = vmatpush1.msra.mxu0 %v319_v28  ;;  %1564 = vmatpush1.msra.mxu1 %v319_v28  ;;  %v313_v17 = vld [vmem:[%s2254_s5 + $0x10] sm:$0xff]  ;;  %v984_v18 = vld [vmem:[%s2415_s4 + $0xf8] sm:$0xff] }
  0x99   : > { %403 = vmatprep.subr.mxu0 %v316_v29  ;;  %1549 = vmatprep.subr.mxu1 %v316_v29  ;;  %v968_v19 = vld [vmem:[%s2415_s4 + $0x78] sm:$0xff]  ;;  %v983_v20 = vld [vmem:[%s2415_s4 + $0xf0] sm:$0xff] }
  0x9a   : > { %404 = vmatpush1.msra.mxu0 %v315_v30  ;;  %1565 = vmatpush1.msra.mxu1 %v315_v30  ;;  %v967_v21 = vld [vmem:[%s2415_s4 + $0x70] sm:$0xff]  ;;  %v980_v26 = vld [vmem:[%s2415_s4 + $0xd8] sm:$0xff]  ;;  %v978_v30 = vld [vmem:[%s2415_s4 + $0xc8] sm:$0xff] }
  0x9b   : > { %405 = vmatprep.subr.mxu0 %v312_v31  ;;  %1550 = vmatprep.subr.mxu1 %v312_v31  ;;  %v964_v27 = vld [vmem:[%s2415_s4 + $0x58] sm:$0xff]  ;;  %v979_v28 = vld [vmem:[%s2415_s4 + $0xd0] sm:$0xff]  ;;  %v962_v31 = vld [vmem:[%s2415_s4 + $0x48] sm:$0xff] }
  0x9c   : > { %406 = vmatpush1.msra.mxu0 %v311_v32  ;;  %1566 = vmatpush1.msra.mxu1 %v311_v32  ;;  %v963_v29 = vld [vmem:[%s2415_s4 + $0x50] sm:$0xff]  ;;  %v977_v32 = vld [vmem:[%s2415_s4 + $0xc0] sm:$0xff] }
  0x9d   : > { %440 = vmatmul.mubr.f32.vlgmr.msra.gmra.mxu0 %v2295_v33  ;;  %488 = vmatmul.mubr.f32.vlgmr.msra.gmra.mxu1 %v2298_v34 }
  0x9e   : > { %536 = vmatprep.subr.mxu1 %v374_v35  ;;  %445 = vmatprep.mubr.f32.mxu0 %v2016_v0  ;;  %v975_v35 = vld [vmem:[%s2415_s4 + $0xb0] sm:$0xff] }
  0x9f   : > { %537 = vmatpush1.msra.mxu1 %v373_v36  ;;  %493 = vmatprep.mubr.f32.mxu1 %v2016_v0  ;;  %v959_v36 = vld [vmem:[%s2415_s4 + $0x30] sm:$0xff] }
  0xa0   : > { %538 = vmatprep.subr.mxu1 %v370_v37  ;;  %1455 = vmatprep.subr.mxu0 %v984_v18  ;;  %v974_v37 = vld [vmem:[%s2415_s4 + $0xa8] sm:$0xff] }
  0xa1   : > { %539 = vmatpush1.msra.mxu1 %v369_v38  ;;  %446 = vmatmul.mubr.f32.gmra.mxu0 %v2308_v39  ;;  %v958_v38 = vld [vmem:[%s2415_s4 + $0x28] sm:$0xff] }
  0xa2   : > { %494 = vmatmul.mubr.f32.gmra.mxu1 %v2312_v40  ;;  %540 = vmatprep.subr.mxu1 %v366_v41  ;;  %v972_v41 = vld [vmem:[%s2415_s4 + $0x98] sm:$0xff] }
  0xa3   : > { %541 = vmatpush1.msra.mxu1 %v365_v42  ;;  %451 = vmatprep.mubr.f32.mxu0 %v2016_v0  ;;  %v956_v42 = vld [vmem:[%s2415_s4 + $0x18] sm:$0xff] }
  0xa4   : > { %542 = vmatprep.subr.mxu1 %v362_v43  ;;  %499 = vmatprep.mubr.f32.mxu1 %v2016_v0  ;;  %v971_v43 = vld [vmem:[%s2415_s4 + $0x90] sm:$0xff] }
  0xa5   : > { %543 = vmatpush1.msra.mxu1 %v361_v44  ;;  %452 = vmatmul.mubr.f32.gmra.mxu0 %v2321_v45  ;;  %v955_v44 = vld [vmem:[%s2415_s4 + $0x10] sm:$0xff] }
  0xa6   : > { %500 = vmatmul.mubr.f32.gmra.mxu1 %v2325_v46  ;;  %544 = vmatprep.subr.mxu1 %v358_v47  ;;  %v969_v47 = vld [vmem:[%s2415_s4 + $0x80] sm:$0xff] }
  0xa7   : > { %545 = vmatpush1.msra.mxu1 %v357_v48  ;;  %457 = vmatprep.mubr.f32.mxu0 %v2016_v0  ;;  %v953_v48 = vld [vmem:[%s2415_s4] sm:$0xff] }
  0xa8   : > { %546 = vmatprep.subr.mxu1 %v354_v49  ;;  %505 = vmatprep.mubr.f32.mxu1 %v2016_v0 }
  0xa9   : > { %547 = vmatpush1.msra.mxu1 %v353_v50  ;;  %458 = vmatmul.mubr.f32.gmra.mxu0 %v2335_v51 }
  0xaa   : > { %506 = vmatmul.mubr.f32.gmra.mxu1 %v2339_v52  ;;  %548 = vmatprep.subr.mxu1 %v350_v53 }
  0xab   : > { %549 = vmatpush1.msra.mxu1 %v349_v54  ;;  %463 = vmatprep.mubr.f32.mxu0 %v2016_v0 }
  0xac   : > { %550 = vmatprep.subr.mxu1 %v346_v55  ;;  %511 = vmatprep.mubr.f32.mxu1 %v2016_v0 }
  0xad   : > { %551 = vmatpush1.msra.mxu1 %v345_v56  ;;  %464 = vmatmul.mubr.f32.gmra.mxu0 %v2349_v57 }
  0xae   : > { %512 = vmatmul.mubr.f32.gmra.mxu1 %v2353_v58  ;;  %552 = vmatprep.subr.mxu1 %v342_v59 }
  0xaf   : > { %553 = vmatpush1.msra.mxu1 %v341_v60  ;;  %469 = vmatprep.mubr.f32.mxu0 %v2016_v0 }
  0xb0   : > { %554 = vmatprep.subr.mxu1 %v338_v61  ;;  %517 = vmatprep.mubr.f32.mxu1 %v2016_v0 }
  0xb1   : > { %555 = vmatpush1.msra.mxu1 %v337_v62  ;;  %470 = vmatmul.mubr.f32.gmra.mxu0 %v300_v63 }
  0xb2   : > { %518 = vmatmul.mubr.f32.gmra.mxu1 %v2365_v1  ;;  %556 = vmatprep.subr.mxu1 %v334_v2 }
  0xb3   : > { %557 = vmatpush1.msra.mxu1 %v333_v3  ;;  %475 = vmatprep.mubr.f32.mxu0 %v2016_v0 }
  0xb4   : > { %558 = vmatprep.subr.mxu1 %v330_v4  ;;  %523 = vmatprep.mubr.f32.mxu1 %v2016_v0 }
  0xb5   : > { %559 = vmatpush1.msra.mxu1 %v329_v5  ;;  %476 = vmatmul.mubr.f32.gmra.mxu0 %v301_v6 }
  0xb6   : > { %524 = vmatmul.mubr.f32.gmra.mxu1 %v2376_v7  ;;  %560 = vmatprep.subr.mxu1 %v326_v8 }
  0xb7   : > { %561 = vmatpush1.msra.mxu1 %v325_v9  ;;  %481 = vmatprep.mubr.f32.mxu0 %v2016_v0 }
  0xb8   : > { %562 = vmatprep.subr.mxu1 %v322_v10  ;;  %529 = vmatprep.mubr.f32.mxu1 %v2016_v0 }
  0xb9   : > { %563 = vmatpush1.msra.mxu1 %v321_v11  ;;  %482 = vmatmul.mubr.f32.gmra.mxu0 %v302_v12 }
  0xba   : > { %530 = vmatmul.mubr.f32.gmra.mxu1 %v2387_v13  ;;  %564 = vmatprep.subr.mxu1 %v318_v14 }
  0xbb   : > { %565 = vmatpush1.msra.mxu1 %v317_v15  ;;  %600 = vmatprep.mubr.f32.mxu1 %v2016_v0 }
  0xbc   : > { %566 = vmatprep.subr.mxu1 %v314_v16  ;;  %1456 = vmatpush3.msra.mxu0 %v968_v19 }
  0xbd   : > { %567 = vmatpush1.msra.mxu1 %v313_v17  ;;  %1457 = vmatprep.subr.mxu0 %v983_v20 }
  0xbe   : > { %601 = vmatmul.mubr.f32.vlgmr.msra.gmra.mxu1 %v2295_v33  ;;  %1458 = vmatpush3.msra.mxu0 %v967_v21  ;;  %v976_v33 = vld [vmem:[%s2415_s4 + $0xb8] sm:$0xff] }
  0xbf   : > { %606 = vmatprep.mubr.f32.mxu1 %v2016_v0  ;;  %1459 = vmatprep.subr.mxu0 %v982_v22 }
  0xc0   : > { %1460 = vmatpush3.msra.mxu0 %v966_v23 }
  0xc1   : > { %1461 = vmatprep.subr.mxu0 %v981_v24 }
  0xc2   : > { %607 = vmatmul.mubr.f32.gmra.mxu1 %v2308_v39  ;;  %1462 = vmatpush3.msra.mxu0 %v965_v25  ;;  %v973_v39 = vld [vmem:[%s2415_s4 + $0xa0] sm:$0xff] }
  0xc3   : > { %612 = vmatprep.mubr.f32.mxu1 %v2016_v0  ;;  %1463 = vmatprep.subr.mxu0 %v980_v26 }
  0xc4   : > { %1464 = vmatpush3.msra.mxu0 %v964_v27 }
  0xc5   : > { %1465 = vmatprep.subr.mxu0 %v979_v28 }
  0xc6   : > { %613 = vmatmul.mubr.f32.gmra.mxu1 %v2321_v45  ;;  %1466 = vmatpush3.msra.mxu0 %v963_v29  ;;  %v970_v45 = vld [vmem:[%s2415_s4 + $0x88] sm:$0xff] }
  0xc7   : > { %618 = vmatprep.mubr.f32.mxu1 %v2016_v0  ;;  %1467 = vmatprep.subr.mxu0 %v978_v30 }
  0xc8   : > { %1468 = vmatpush3.msra.mxu0 %v962_v31 }
  0xc9   : > { %1469 = vmatprep.subr.mxu0 %v977_v32 }
  0xca   : > { %619 = vmatmul.mubr.f32.gmra.mxu1 %v2335_v51 }
  0xcb   : > { %624 = vmatprep.mubr.f32.mxu1 %v2016_v0 }
  0xce   : > { %625 = vmatmul.mubr.f32.gmra.mxu1 %v2349_v57 }
  0xcf   : > { %630 = vmatprep.mubr.f32.mxu1 %v2016_v0 }
  0xd2   : > { %631 = vmatmul.mubr.f32.gmra.mxu1 %v300_v63 }
  0xd3   : > { %636 = vmatprep.mubr.f32.mxu1 %v2016_v0 }
  0xd6   : > { %637 = vmatmul.mubr.f32.gmra.mxu1 %v301_v6 }
  0xd7   : > { %642 = vmatprep.mubr.f32.mxu1 %v2016_v0 }
  0xda   : > { %643 = vmatmul.mubr.f32.gmra.mxu1 %v302_v12 }
  0xdb   : > { %648 = vmatprep.mubr.f32.mxu1 %v2016_v0 }
  0xde   : > { %649 = vmatmul.mubr.f32.gmra.mxu1 %v2298_v34  ;;  %v960_v34 = vld [vmem:[%s2415_s4 + $0x38] sm:$0xff] }
  0xdf   : > { %654 = vmatprep.mubr.f32.mxu1 %v2016_v0 }
  0xe2   : > { %655 = vmatmul.mubr.f32.gmra.mxu1 %v2312_v40  ;;  %v957_v40 = vld [vmem:[%s2415_s4 + $0x20] sm:$0xff] }
  0xe3   : > { %660 = vmatprep.mubr.f32.mxu1 %v2016_v0 }
  0xe6   : > { %661 = vmatmul.mubr.f32.gmra.mxu1 %v2325_v46  ;;  %v954_v46 = vld [vmem:[%s2415_s4 + $0x8] sm:$0xff] }
  0xe7   : > { %666 = vmatprep.mubr.f32.mxu1 %v2016_v0 }
  0xea   : > { %667 = vmatmul.mubr.f32.gmra.mxu1 %v2339_v52 }
  0xeb   : > { %672 = vmatprep.mubr.f32.mxu1 %v2016_v0 }
  0xee   : > { %673 = vmatmul.mubr.f32.gmra.mxu1 %v2353_v58 }
  0xef   : > { %678 = vmatprep.mubr.f32.mxu1 %v2016_v0 }
  0xf2   : > { %679 = vmatmul.mubr.f32.gmra.mxu1 %v2365_v1 }
  0xf3   : > { %684 = vmatprep.mubr.f32.mxu1 %v2016_v0 }
  0xf6   : > { %685 = vmatmul.mubr.f32.gmra.mxu1 %v2376_v7 }
  0xf7   : > { %690 = vmatprep.mubr.f32.mxu1 %v2016_v0  ;;  %v961_v0 = vld [vmem:[%s2415_s4 + $0x40] sm:$0xff] }
  0xf8   : > { %1470 = vmatpush3.msra.mxu0 %v961_v0 }
  0xf9   : > { %1471 = vmatprep.subr.mxu0 %v976_v33 }
  0xfa   : > { %691 = vmatmul.mubr.f32.gmra.mxu1 %v2387_v13  ;;  %1472 = vmatpush3.msra.mxu0 %v960_v34 }
  0xfb   : > { %1473 = vmatprep.subr.mxu0 %v975_v35 }
  0xfc   : > { %1474 = vmatpush3.msra.mxu0 %v959_v36 }
  0xfd   : > { %1475 = vmatprep.subr.mxu0 %v974_v37 }
  0xfe   : > { %1476 = vmatpush3.msra.mxu0 %v958_v38 }
  0xff   : > { %1477 = vmatprep.subr.mxu0 %v973_v39 }
 0x100   : > { %1478 = vmatpush3.msra.mxu0 %v957_v40 }
 0x101   : > { %1479 = vmatprep.subr.mxu0 %v972_v41 }
 0x102   : > { %1480 = vmatpush3.msra.mxu0 %v956_v42 }
 0x103   : > { %1481 = vmatprep.subr.mxu0 %v971_v43 }
 0x104   : > { %1482 = vmatpush3.msra.mxu0 %v955_v44 }
 0x105   : > { %1483 = vmatprep.subr.mxu0 %v970_v45 }
 0x106   : > { %1484 = vmatpush3.msra.mxu0 %v954_v46 }
 0x107   : > { %1485 = vmatprep.subr.mxu0 %v969_v47 }
 0x108   : > { %1486 = vmatpush3.msra.mxu0 %v953_v48 }
 0x15d   : > { %v2460_v49 = vpop.f32.mrf.mxu0  ;;  %v2462_v50 = vpop.f32.mrf.mxu1 }
 0x15e   : > { %v1407_v51 = vmul.f32 -1.442695, %v2460_v49  ;;  %v1423_v40 = vmul.f32 -1.442695, %v2462_v50 }
 0x15f   : > { %v2465_v52 = vpop.f32.mrf.mxu0  ;;  %v2467_v53 = vpop.f32.mrf.mxu1 }
 0x160   : > { %1675 = vpow2.f32 %v1407_v51  ;;  %v1408_v54 = vmul.f32 -1.442695, %v2465_v52 }
 0x161   : > { %v2470_v55 = vpop.f32.mrf.mxu0 }
 0x162   : > { %1677 = vpow2.f32 %v1408_v54  ;;  %v1409_v56 = vmul.f32 -1.442695, %v2470_v55  ;;  %v2473_v57 = vpop.f32.mrf.mxu1  ;;  %v1424_v54 = vmul.f32 -1.442695, %v2467_v53 }
 0x163   : > { %v2475_v58 = vpop.f32.mrf.mxu0 }
 0x164   : > { %1679 = vpow2.f32 %v1409_v56  ;;  %v1410_v59 = vmul.f32 -1.442695, %v2475_v58  ;;  %v2478_v60 = vpop.f32.mrf.mxu1 }
 0x165   : > { %v2480_v61 = vpop.f32.mrf.mxu0 }
 0x166   : > { %1681 = vpow2.f32 %v1410_v59  ;;  %v1411_v62 = vmul.f32 -1.442695, %v2480_v61  ;;  %v2483_v63 = vpop.f32.mrf.mxu1 }
 0x167   : > { %v2485_v1 = vpop.f32.mrf.mxu0 }
 0x168   : > { %1683 = vpow2.f32 %v1411_v62  ;;  %v1412_v2 = vmul.f32 -1.442695, %v2485_v1  ;;  %v2488_v3 = vpop.f32.mrf.mxu1 }
 0x169   : > { %v2490_v4 = vpop.f32.mrf.mxu0 }
 0x16a   : > { %1685 = vpow2.f32 %v1412_v2  ;;  %v1413_v5 = vmul.f32 -1.442695, %v2490_v4  ;;  %v2493_v6 = vpop.f32.mrf.mxu1 }
 0x16b   : > { %v2495_v7 = vpop.f32.mrf.mxu0 }
 0x16c   : > { %1687 = vpow2.f32 %v1413_v5  ;;  %v1414_v8 = vmul.f32 -1.442695, %v2495_v7  ;;  %v2498_v9 = vpop.f32.mrf.mxu1 }
 0x16d   : > { %v1676_v10 = vpop.eup %1675  ;;  %v2500_v11 = vpop.f32.mrf.mxu0 }
 0x16e   : > { %v793_v12 = vadd.f32 1.0, %v1676_v10  ;;  %1689 = vpow2.f32 %v1414_v8  ;;  %v2502_v13 = vpop.f32.mrf.mxu1  ;;  %v1415_v37 = vmul.f32 -1.442695, %v2500_v11 }
 0x16f   : > { %v1678_v14 = vpop.eup %1677  ;;  %v2504_v15 = vpop.f32.mrf.mxu0 }
 0x170   : > { %1691 = vrcp.f32 %v793_v12  ;;  %v794_v16 = vadd.f32 1.0, %v1678_v14  ;;  %v2506_v17 = vpop.f32.mrf.mxu1  ;;  %v1416_v41 = vmul.f32 -1.442695, %v2504_v15 }
 0x171   : > { %v1680_v18 = vpop.eup %1679  ;;  %v2510_v22 = vpop.f32.mrf.mxu0 }
 0x172   : > { %1693 = vrcp.f32 %v794_v16  ;;  %v795_v19 = vadd.f32 1.0, %v1680_v18  ;;  %v2508_v20 = vpop.f32.mrf.mxu1  ;;  %v1417_v47 = vmul.f32 -1.442695, %v2510_v22  ;;  %v1425_v16 = vmul.f32 -1.442695, %v2473_v57 }
 0x173   : > { %v1682_v21 = vpop.eup %1681  ;;  %v2516_v29 = vpop.f32.mrf.mxu0 }
 0x174   : > { %1695 = vrcp.f32 %v795_v19  ;;  %v796_v23 = vadd.f32 1.0, %v1682_v21  ;;  %v2512_v24 = vpop.f32.mrf.mxu1  ;;  %v1418_v56 = vmul.f32 -1.442695, %v2516_v29 }
 0x175   : > { %v1684_v25 = vpop.eup %1683  ;;  %v2522_v35 = vpop.f32.mrf.mxu0 }
 0x176   : > { %1697 = vrcp.f32 %v796_v23  ;;  %v797_v26 = vadd.f32 1.0, %v1684_v25  ;;  %v2514_v27 = vpop.f32.mrf.mxu1  ;;  %v1419_v10 = vmul.f32 -1.442695, %v2522_v35  ;;  %v1426_v23 = vmul.f32 -1.442695, %v2478_v60 }
 0x177   : > { %v1686_v28 = vpop.eup %1685  ;;  %v2530_v45 = vpop.f32.mrf.mxu0 }
 0x178   : > { %1699 = vrcp.f32 %v797_v26  ;;  %v798_v30 = vadd.f32 1.0, %v1686_v28  ;;  %v2518_v31 = vpop.f32.mrf.mxu1  ;;  %v1420_v18 = vmul.f32 -1.442695, %v2530_v45 }
 0x179   : > { %v1688_v32 = vpop.eup %1687  ;;  %v2537_v5 = vpop.f32.mrf.mxu0 }
 0x17a   : > { %1701 = vrcp.f32 %v798_v30  ;;  %v799_v0 = vadd.f32 1.0, %v1688_v32  ;;  %v2520_v33 = vpop.f32.mrf.mxu1  ;;  %v1421_v30 = vmul.f32 -1.442695, %v2537_v5 }
 0x17b   : > { %v1690_v34 = vpop.eup %1689  ;;  %v2545_v25 = vpop.f32.mrf.mxu0 }
 0x17c   : > { %1703 = vrcp.f32 %v799_v0  ;;  %v800_v36 = vadd.f32 1.0, %v1690_v34  ;;  %v2525_v38 = vpop.f32.mrf.mxu1  ;;  %v1427_v34 = vmul.f32 -1.442695, %v2483_v63 }
 0x17d   : > { %v1692_v39 = vpop.eup %1691 }
 0x17e   : > { %1705 = vrcp.f32 %v800_v36  ;;  %v602_v42 = vpop.f32.mrf.mxu1  ;;  %v889_v44 = vmul.f32 %v1692_v39, %v2460_v49  ;;  %v1422_v36 = vmul.f32 -1.442695, %v2545_v25 }
 0x17f   : > { %v1694_v43 = vpop.eup %1693  ;;  %1707 = vpow2.f32 %v1415_v37 }
 0x180   : > { %v890_v46 = vmul.f32 %v1694_v43, %v2465_v52  ;;  %v604_v48 = vpop.f32.mrf.mxu1  ;;  %1709 = vpow2.f32 %v1423_v40  ;;  %v921_v8 = vmul.f32 %v889_v44, %v602_v42  ;;  %v1428_v40 = vmul.f32 -1.442695, %v2488_v3 }
 0x181   : > { %v1696_v51 = vpop.eup %1695  ;;  %1711 = vpow2.f32 %v1416_v41 }
 0x182   : > { %v922_v59 = vmul.f32 %v890_v46, %v604_v48  ;;  %v608_v62 = vpop.f32.mrf.mxu1  ;;  %v891_v49 = vmul.f32 %v1696_v51, %v2470_v55  ;;  %1713 = vpow2.f32 %v1417_v47  ;;  %v1429_v46 = vmul.f32 -1.442695, %v2493_v6 }
 0x183   : > { %v1698_v2 = vpop.eup %1697  ;;  %1715 = vpow2.f32 %v1424_v54 }
 0x184   : > { %v892_v52 = vmul.f32 %v1698_v2, %v2475_v58  ;;  %v610_v12 = vpop.f32.mrf.mxu1  ;;  %1049 = vmatprep.mubr.f32.mxu0 %v922_v59  ;;  %1717 = vpow2.f32 %v1418_v56  ;;  %v923_v26 = vmul.f32 %v891_v49, %v608_v62 }
 0x185   : > { %v1700_v14 = vpop.eup %1699  ;;  %1050 = vmatmul.mubr.f32.vlgmr.msra.gmra.mxu0 %v921_v8  ;;  %1719 = vpow2.f32 %v1419_v10 }
 0x186   : > { %v924_v19 = vmul.f32 %v892_v52, %v610_v12  ;;  %v614_v55 = vpop.f32.mrf.mxu1  ;;  %v893_v58 = vmul.f32 %v1700_v14, %v2480_v61  ;;  %1721 = vpow2.f32 %v1425_v16  ;;  %v1432_v14 = vmul.f32 -1.442695, %v2506_v17 }
 0x187   : > { %v1702_v21 = vpop.eup %1701  ;;  %1723 = vpow2.f32 %v1420_v18 }
 0x188   : > { %v894_v28 = vmul.f32 %v1702_v21, %v2485_v1  ;;  %v616_v32 = vpop.f32.mrf.mxu1  ;;  %1054 = vmatprep.mubr.f32.mxu0 %v924_v19  ;;  %1725 = vpow2.f32 %v1426_v23  ;;  %v925_v41 = vmul.f32 %v893_v58, %v614_v55 }
 0x189   : > { %v1704_v0 = vpop.eup %1703  ;;  %1055 = vmatmul.mubr.f32.gmra.mxu0 %v923_v26  ;;  %1727 = vpow2.f32 %v1421_v30 }
 0x18a   : > { %v926_v37 = vmul.f32 %v894_v28, %v616_v32  ;;  %v620_v61 = vpop.f32.mrf.mxu1  ;;  %v895_v1 = vmul.f32 %v1704_v0, %v2490_v4  ;;  %1729 = vpow2.f32 %v1427_v34  ;;  %v1430_v4 = vmul.f32 -1.442695, %v2498_v9 }
 0x18b   : > { %v1706_v39 = vpop.eup %1705  ;;  %1731 = vpow2.f32 %v1422_v36  ;;  %v1434_v28 = vmul.f32 -1.442695, %v2512_v24  ;;  %v1431_v36 = vmul.f32 -1.442695, %v2502_v13 }
 0x18c   : > { %v896_v42 = vmul.f32 %v1706_v39, %v2495_v7  ;;  %v622_v43 = vpop.f32.mrf.mxu1  ;;  %1059 = vmatprep.mubr.f32.mxu0 %v926_v37  ;;  %v1708_v44 = vpop.eup %1707  ;;  %1733 = vpow2.f32 %v1428_v40  ;;  %v927_v59 = vmul.f32 %v895_v1, %v620_v61 }
 0x18d   : > { %1060 = vmatmul.mubr.f32.gmra.mxu0 %v925_v41  ;;  %v1710_v47 = vpop.eup %1709  ;;  %v801_v48 = vadd.f32 1.0, %v1708_v44 }
 0x18e   : > { %v928_v51 = vmul.f32 %v896_v42, %v622_v43  ;;  %v2555_v54 = vpop.f32.mrf.mxu1  ;;  %v1712_v56 = vpop.eup %1711  ;;  %v809_v49 = vadd.f32 1.0, %v1710_v47  ;;  %v1436_v42 = vmul.f32 -1.442695, %v2518_v31  ;;  %v1433_v47 = vmul.f32 -1.442695, %v2508_v20 }
 0x18f   : > { %1735 = vrcp.f32 %v801_v48  ;;  %v802_v7 = vadd.f32 1.0, %v1712_v56  ;;  %v1714_v2 = vpop.eup %1713 }
 0x190   : > { %v2558_v62 = vpop.f32.mrf.mxu1  ;;  %1064 = vmatprep.mubr.f32.mxu0 %v928_v51  ;;  %1737 = vpow2.f32 %v1429_v46  ;;  %v1716_v8 = vpop.eup %1715  ;;  %v803_v52 = vadd.f32 1.0, %v1714_v2 }
 0x191   : > { %1065 = vmatmul.mubr.f32.gmra.mxu0 %v927_v59  ;;  %1739 = vrcp.f32 %v802_v7  ;;  %v1718_v12 = vpop.eup %1717  ;;  %v810_v55 = vadd.f32 1.0, %v1716_v8  ;;  %v1438_v8 = vmul.f32 -1.442695, %v2525_v38 }
 0x192   : > { %v2560_v10 = vpop.f32.mrf.mxu1  ;;  %1741 = vpow2.f32 %v1430_v4  ;;  %v804_v16 = vadd.f32 1.0, %v1718_v12  ;;  %v1720_v19 = vpop.eup %1719 }
 0x193   : > { %1743 = vrcp.f32 %v803_v52  ;;  %v1722_v21 = vpop.eup %1721  ;;  %v805_v23 = vadd.f32 1.0, %v1720_v19 }
 0x194   : > { %v2563_v18 = vpop.f32.mrf.mxu1  ;;  %1745 = vrcp.f32 %v809_v49  ;;  %v1724_v26 = vpop.eup %1723  ;;  %v811_v51 = vadd.f32 1.0, %v1722_v21 }
 0x195   : > { %1747 = vrcp.f32 %v804_v16  ;;  %v1726_v30 = vpop.eup %1725  ;;  %v806_v32 = vadd.f32 1.0, %v1724_v26 }
 0x196   : > { %v2565_v58 = vpop.f32.mrf.mxu1  ;;  %1749 = vpow2.f32 %v1432_v14  ;;  %v1728_v34 = vpop.eup %1727  ;;  %v812_v1 = vadd.f32 1.0, %v1726_v30  ;;  %v1435_v14 = vmul.f32 -1.442695, %v2514_v27 }
 0x197   : > { %1751 = vrcp.f32 %v805_v23  ;;  %v1730_v37 = vpop.eup %1729  ;;  %v807_v61 = vadd.f32 1.0, %v1728_v34 }
 0x198   : > { %v2568_v0 = vpop.f32.mrf.mxu1  ;;  %1753 = vrcp.f32 %v810_v55  ;;  %v1732_v40 = vpop.eup %1731 }
 0x199   : > { %1755 = vrcp.f32 %v806_v32  ;;  %v1734_v41 = vpop.eup %1733  ;;  %v808_v43 = vadd.f32 1.0, %v1732_v40 }
 0x19a   : > { %v2571_v39 = vpop.f32.mrf.mxu1  ;;  %1757 = vpow2.f32 %v1434_v28  ;;  %v814_v59 = vadd.f32 1.0, %v1734_v41 }
 0x19b   : > { %1759 = vrcp.f32 %v807_v61 }
 0x19c   : > { %v2574_v44 = vpop.f32.mrf.mxu1  ;;  %v1736_v46 = vpop.eup %1735  ;;  %1761 = vpow2.f32 %v1431_v36 }
 0x19d   : > { %v1738_v48 = vpop.eup %1737  ;;  %1763 = vrcp.f32 %v808_v43  ;;  %v897_v7 = vmul.f32 %v1736_v46, %v2500_v11  ;;  %v813_v11 = vadd.f32 1.0, %v1730_v37 }
 0x19e   : > { %v2577_v56 = vpop.f32.mrf.mxu1  ;;  %v1740_v4 = vpop.eup %1739  ;;  %1765 = vrcp.f32 %v812_v1  ;;  %v815_v46 = vadd.f32 1.0, %v1738_v48 }
 0x19f   : > { %v1742_v2 = vpop.eup %1741  ;;  %v898_v49 = vmul.f32 %v1740_v4, %v2504_v15  ;;  %1767 = vpow2.f32 %v1436_v42  ;;  %v929_v23 = vmul.f32 %v897_v7, %v2555_v54 }
 0x1a0   : > { %v652_v52 = vpop.f32.mrf.mxu1  ;;  %v1744_v12 = vpop.eup %1743  ;;  %1769 = vpow2.f32 %v1433_v47  ;;  %v816_v28 = vadd.f32 1.0, %v1742_v2 }
 0x1a1   : > { %v2583_v16 = vpop.eup %1745  ;;  %1771 = vrcp.f32 %v811_v51  ;;  %v930_v19 = vmul.f32 %v898_v49, %v2558_v62  ;;  %v899_v15 = vmul.f32 %v1744_v12, %v2510_v22  ;;  %v1437_v62 = vmul.f32 -1.442695, %v2520_v33 }
 0x1a2   : > { %v2586_v55 = vpop.f32.mrf.mxu1  ;;  %v1748_v21 = vpop.eup %1747  ;;  %1773 = vrcp.f32 %v814_v59 }
 0x1a3   : > { %v1750_v26 = vpop.eup %1749  ;;  %v900_v30 = vmul.f32 %v1748_v21, %v2516_v29  ;;  %1775 = vpow2.f32 %v1438_v8  ;;  %1069 = vmatprep.mubr.f32.mxu0 %v930_v19  ;;  %v931_v40 = vmul.f32 %v899_v15, %v2560_v10 }
 0x1a4   : > { %v658_v32 = vpop.f32.mrf.mxu1  ;;  %v1752_v34 = vpop.eup %1751  ;;  %1777 = vpow2.f32 %v1435_v14  ;;  %1070 = vmatmul.mubr.f32.gmra.mxu0 %v929_v23  ;;  %v818_v1 = vadd.f32 1.0, %v1750_v26  ;;  %v905_v23 = vmul.f32 %v2583_v16, %v2462_v50 }
 0x1a5   : > { %v1754_v36 = vpop.eup %1753  ;;  %v932_v37 = vmul.f32 %v900_v30, %v2563_v18  ;;  %1779 = vrcp.f32 %v813_v11  ;;  %v901_v54 = vmul.f32 %v1752_v34, %v2522_v35 }
 0x1a6   : > { %v2593_v61 = vpop.f32.mrf.mxu1  ;;  %v1756_v22 = vpop.eup %1755  ;;  %1781 = vrcp.f32 %v816_v28  ;;  %v906_v7 = vmul.f32 %v1754_v36, %v2467_v53  ;;  %v937_v28 = vmul.f32 %v905_v23, %v2577_v56 }
 0x1a7   : > { %v1758_v29 = vpop.eup %1757  ;;  %v902_v41 = vmul.f32 %v1756_v22, %v2530_v45  ;;  %1074 = vmatprep.mubr.f32.mxu0 %v932_v37  ;;  %1783 = vpow2.f32 %v1437_v62  ;;  %v933_v10 = vmul.f32 %v901_v54, %v2565_v58 }
 0x1a8   : > { %v664_v42 = vpop.f32.mrf.mxu1  ;;  %v1760_v43 = vpop.eup %1759  ;;  %1075 = vmatmul.mubr.f32.gmra.mxu0 %v931_v40  ;;  %1785 = vrcp.f32 %v818_v1  ;;  %v820_v45 = vadd.f32 1.0, %v1758_v29  ;;  %v938_v14 = vmul.f32 %v906_v7, %v652_v52 }
 0x1a9   : > { %v1762_v18 = vpop.eup %1761  ;;  %v934_v47 = vmul.f32 %v902_v41, %v2568_v0  ;;  %v903_v35 = vmul.f32 %v1760_v43, %v2537_v5  ;;  %1787 = vrcp.f32 %v815_v46 }
 0x1aa   : > { %v2599_v51 = vpop.f32.mrf.mxu1  ;;  %v1764_v4 = vpop.eup %1763  ;;  %v817_v8 = vadd.f32 1.0, %v1762_v18  ;;  %1789 = vrcp.f32 %v820_v45 }
 0x1ab   : > { %v1766_v59 = vpop.eup %1765  ;;  %v904_v2 = vmul.f32 %v1764_v4, %v2545_v25  ;;  %1079 = vmatprep.mubr.f32.mxu0 %v934_v47  ;;  %v935_v58 = vmul.f32 %v903_v35, %v2571_v39 }
 0x1ac   : > { %v670_v48 = vpop.f32.mrf.mxu1  ;;  %v1768_v49 = vpop.eup %1767  ;;  %1080 = vmatmul.mubr.f32.gmra.mxu0 %v933_v10  ;;  %v908_v53 = vmul.f32 %v1766_v59, %v2478_v60  ;;  %1791 = vrcp.f32 %v817_v8 }
 0x1ad   : > { %v1770_v0 = vpop.eup %1769  ;;  %v936_v12 = vmul.f32 %v904_v2, %v2574_v44  ;;  %v822_v11 = vadd.f32 1.0, %v1768_v49 }
 0x1ae   : > { %v674_v5 = vpop.f32.mrf.mxu1  ;;  %v1772_v19 = vpop.eup %1771  ;;  %v819_v26 = vadd.f32 1.0, %v1770_v0  ;;  %v940_v52 = vmul.f32 %v908_v53, %v658_v32 }
 0x1af   : > { %v1774_v21 = vpop.eup %1773  ;;  %1084 = vmatprep.mubr.f32.mxu0 %v936_v12  ;;  %1793 = vrcp.f32 %v822_v11  ;;  %v907_v36 = vmul.f32 %v1772_v19, %v2473_v57 }
 0x1b0   : > { %v676_v25 = vpop.f32.mrf.mxu1  ;;  %v1776_v15 = vpop.eup %1775  ;;  %1085 = vmatmul.mubr.f32.gmra.mxu0 %v935_v58  ;;  %v910_v60 = vmul.f32 %v1774_v21, %v2488_v3  ;;  %1795 = vrcp.f32 %v819_v26 }
 0x1b1   : > { %v1778_v44 = vpop.eup %1777  ;;  %1089 = vmatprep.mubr.f32.mxu0 %v938_v14  ;;  %v824_v34 = vadd.f32 1.0, %v1776_v15  ;;  %v939_v22 = vmul.f32 %v907_v36, %v2586_v55 }
 0x1b2   : > { %v680_v39 = vpop.f32.mrf.mxu1  ;;  %v1780_v30 = vpop.eup %1779  ;;  %v821_v37 = vadd.f32 1.0, %v1778_v44  ;;  %v942_v16 = vmul.f32 %v910_v60, %v664_v42 }
 0x1b3   : > { %v1782_v62 = vpop.eup %1781  ;;  %1797 = vrcp.f32 %v824_v34  ;;  %v909_v3 = vmul.f32 %v1780_v30, %v2483_v63 }
 0x1b4   : > { %1090 = vmatmul.mubr.f32.gmra.mxu0 %v937_v28  ;;  %v1784_v50 = vpop.eup %1783  ;;  %v682_v32 = vpop.f32.mrf.mxu1  ;;  %v912_v56 = vmul.f32 %v1782_v62, %v2498_v9  ;;  %1799 = vrcp.f32 %v821_v37 }
 0x1b5   : > { %1094 = vmatprep.mubr.f32.mxu0 %v940_v52  ;;  %v1786_v54 = vpop.eup %1785  ;;  %v823_v40 = vadd.f32 1.0, %v1784_v50  ;;  %v941_v1 = vmul.f32 %v909_v3, %v2593_v61 }
 0x1b6   : > { %v1788_v29 = vpop.eup %1787  ;;  %v944_v57 = vmul.f32 %v912_v56, %v670_v48  ;;  %v686_v41 = vpop.f32.mrf.mxu1  ;;  %v914_v42 = vmul.f32 %v1786_v54, %v2506_v17 }
 0x1b7   : > { %v1790_v43 = vpop.eup %1789  ;;  %v911_v55 = vmul.f32 %v1788_v29, %v2493_v6  ;;  %1801 = vrcp.f32 %v823_v40 }
 0x1b8   : > { %1095 = vmatmul.mubr.f32.gmra.mxu0 %v939_v22  ;;  %v946_v46 = vmul.f32 %v914_v42, %v676_v25  ;;  %v688_v18 = vpop.f32.mrf.mxu1  ;;  %v916_v47 = vmul.f32 %v1790_v43, %v2512_v24 }
 0x1b9   : > { %1099 = vmatprep.mubr.f32.mxu0 %v942_v16  ;;  %v1792_v9 = vpop.eup %1791  ;;  %v943_v63 = vmul.f32 %v911_v55, %v2599_v51 }
 0x1ba   : > { %v913_v35 = vmul.f32 %v1792_v9, %v2502_v13  ;;  %v948_v17 = vmul.f32 %v916_v47, %v682_v32  ;;  %v692_v59 = vpop.f32.mrf.mxu1 }
 0x1bc   : > { %1100 = vmatmul.mubr.f32.gmra.mxu0 %v941_v1  ;;  %v1794_v4 = vpop.eup %1793  ;;  %v945_v10 = vmul.f32 %v913_v35, %v674_v5  ;;  %v694_v24 = vpop.f32.mrf.mxu1 }
 0x1bd   : > { %1104 = vmatprep.mubr.f32.mxu0 %v944_v57  ;;  %v1796_v61 = vpop.eup %1795  ;;  %v918_v6 = vmul.f32 %v1794_v4, %v2518_v31 }
 0x1be   : > { %v915_v45 = vmul.f32 %v1796_v61, %v2508_v20 }
 0x1bf   : > { %v950_v51 = vmul.f32 %v918_v6, %v688_v18 }
 0x1c0   : > { %1105 = vmatmul.mubr.f32.gmra.mxu0 %v943_v63  ;;  %v1798_v7 = vpop.eup %1797  ;;  %v947_v48 = vmul.f32 %v915_v45, %v680_v39 }
 0x1c1   : > { %1109 = vmatprep.mubr.f32.mxu0 %v946_v46  ;;  %v1800_v2 = vpop.eup %1799  ;;  %v920_v49 = vmul.f32 %v1798_v7, %v2525_v38 }
 0x1c2   : > { %v917_v13 = vmul.f32 %v1800_v2, %v2514_v27 }
 0x1c3   : > { %v952_v0 = vmul.f32 %v920_v49, %v694_v24 }
 0x1c4   : > { %1110 = vmatmul.mubr.f32.gmra.mxu0 %v945_v10  ;;  %v1802_v8 = vpop.eup %1801  ;;  %v949_v12 = vmul.f32 %v917_v13, %v686_v41 }
 0x1c5   : > { %1114 = vmatprep.mubr.f32.mxu0 %v948_v17  ;;  %v919_v31 = vmul.f32 %v1802_v8, %v2520_v33 }
 0x1c7   : > { %v951_v20 = vmul.f32 %v919_v31, %v692_v59 }
 0x1c8   : > { %1115 = vmatmul.mubr.f32.gmra.mxu0 %v947_v48 }
 0x1c9   : > { %1119 = vmatprep.mubr.f32.mxu0 %v950_v51 }
 0x1cc   : > { %1120 = vmatmul.mubr.f32.gmra.mxu0 %v949_v12 }
 0x1cd   : > { %1124 = vmatprep.mubr.f32.mxu0 %v952_v0 }
 0x1d0   : > { %1125 = vmatmul.mubr.f32.gmra.mxu0 %v951_v20 }
 0x245   : > { %v1487_v14 = vpop.f32.mrf.mxu0 }
 0x247   : > { %v1488_v5 = vpop.f32.mrf.mxu0 }
 0x248   : > { %v2627_v19 = vadd.f32 %v1488_v5, %v1487_v14 }
 0x249   : > { %v1490_v58 = vpop.f32.mrf.mxu0 }
 0x24b   : > { %v1491_v21 = vpop.f32.mrf.mxu0 }
 0x24c   : > { %v2629_v38 = vadd.f32 %v1491_v21, %v1490_v58 }
 0x24d   : > { %v1493_v27 = vpop.f32.mrf.mxu0 }
 0x24f   : > { %v1494_v53 = vpop.f32.mrf.mxu0 }
 0x250   : > { %v2631_v11 = vadd.f32 %v1494_v53, %v1493_v27 }
 0x251   : > { %v1496_v25 = vpop.f32.mrf.mxu0 }
 0x253   : > { %v1497_v15 = vpop.f32.mrf.mxu0 }
 0x254   : > { %v2633_v23 = vadd.f32 %v1497_v15, %v1496_v25 }
 0x264   : > { %v1499_v33 = vpop.f32.mrf.mxu0 }
 0x266   : > { %v1500_v26 = vpop.f32.mrf.mxu0 }
 0x267   : > { %v2635_v44 = vadd.f32 %v1500_v26, %v1499_v33 }
 0x268   : > { %v1502_v52 = vpop.f32.mrf.mxu0 }
 0x26a   : > { %v1503_v28 = vpop.f32.mrf.mxu0 }
 0x26b   : > { %v2637_v39 = vadd.f32 %v1503_v28, %v1502_v52 }
 0x26c   : > { %v1505_v30 = vpop.f32.mrf.mxu0 }
 0x26e   : > { %v1506_v60 = vpop.f32.mrf.mxu0 }
 0x26f   : > { %v2639_v34 = vadd.f32 %v1506_v60, %v1505_v30 }
 0x270   : > { %v1508_v62 = vpop.f32.mrf.mxu0 }
 0x272   : > { %v1509_v36 = vpop.f32.mrf.mxu0 }
 0x273   : > { %v2641_v37 = vadd.f32 %v1509_v36, %v1508_v62 }
 0x274   : > { %v1511_v50 = vpop.f32.mrf.mxu0 }
 0x276   : > { %v1512_v16 = vpop.f32.mrf.mxu0 }
 0x277   : > { %v2643_v22 = vadd.f32 %v1512_v16, %v1511_v50 }
 0x278   : > { %v1514_v32 = vpop.f32.mrf.mxu0 }
 0x27a   : > { %v1515_v56 = vpop.f32.mrf.mxu0 }
 0x27b   : > { %v2645_v54 = vadd.f32 %v1515_v56, %v1514_v32 }
 0x27c   : > { %v1517_v3 = vpop.f32.mrf.mxu0 }
 0x27e   : > { %v1518_v40 = vpop.f32.mrf.mxu0 }
 0x27f   : > { %v2647_v29 = vadd.f32 %v1518_v40, %v1517_v3 }
 0x280   : > { %v1520_v57 = vpop.f32.mrf.mxu0 }
 0x282   : > { %v1521_v1 = vpop.f32.mrf.mxu0 }
 0x283   : > { %v2649_v41 = vadd.f32 %v1521_v1, %v1520_v57 }
 0x284   : > { %v1523_v42 = vpop.f32.mrf.mxu0 }
 0x286   : > { %v1524_v43 = vpop.f32.mrf.mxu0 }
 0x287   : > { %v2651_v55 = vadd.f32 %v1524_v43, %v1523_v42 }
 0x288   : > { %v1526_v9 = vpop.f32.mrf.mxu0 }
 0x28a   : > { %v1527_v46 = vpop.f32.mrf.mxu0 }
 0x28b   : > { %v2653_v63 = vadd.f32 %v1527_v46, %v1526_v9 }
 0x28c   : > { %v1529_v18 = vpop.f32.mrf.mxu0 }
 0x28e   : > { %v1530_v47 = vpop.f32.mrf.mxu0 }
 0x28f   : > { %v2655_v4 = vadd.f32 %v1530_v47, %v1529_v18  ;;  %1133 = sbr.rel (%p1439_p7) target bundleno = 668 (0x29c), region = 48 }
 0x290   : > { %v1532_v35 = vpop.f32.mrf.mxu0 }
 0x292   : > { %v1533_v61 = vpop.f32.mrf.mxu0 }
 0x293   : > { %v2657_v17 = vadd.f32 %v1533_v61, %v1532_v35 }
 0x294   : > { %1134 = vst [vmem:[#allocation2 + $0x30] sm:$0xff] %v2627_v19  ;;  %1135 = vst [vmem:[#allocation2] sm:$0xff] %v2629_v38 }
 0x295   : > { %1136 = vst [vmem:[#allocation2 + $0x58] sm:$0xff] %v2631_v11  ;;  %1137 = vst [vmem:[#allocation2 + $0x18] sm:$0xff] %v2633_v23 }
 0x296   : > { %1138 = vst [vmem:[#allocation2 + $0x50] sm:$0xff] %v2635_v44  ;;  %1139 = vst [vmem:[#allocation2 + $0x68] sm:$0xff] %v2637_v39 }
 0x297   : > { %1140 = vst [vmem:[#allocation2 + $0x8] sm:$0xff] %v2639_v34  ;;  %1141 = vst [vmem:[#allocation2 + $0x48] sm:$0xff] %v2641_v37 }
 0x298   : > { %1142 = vst [vmem:[#allocation2 + $0x40] sm:$0xff] %v2643_v22  ;;  %1143 = vst [vmem:[#allocation2 + $0x20] sm:$0xff] %v2645_v54 }
 0x299   : > { %1144 = vst [vmem:[#allocation2 + $0x10] sm:$0xff] %v2647_v29  ;;  %1145 = vst [vmem:[#allocation2 + $0x38] sm:$0xff] %v2649_v41 }
 0x29a   : > { %1146 = vst [vmem:[#allocation2 + $0x60] sm:$0xff] %v2651_v55  ;;  %1147 = vst [vmem:[#allocation2 + $0x70] sm:$0xff] %v2653_v63 }
 0x29b   : > { %1148 = vst [vmem:[#allocation2 + $0x78] sm:$0xff] %v2655_v4  ;;  %1149 = vst [vmem:[#allocation2 + $0x28] sm:$0xff] %v2657_v17 }
 0x29c PF: > { %p1440_p12 = scmp.le.s32.totalorder %s1989_s18, 0 }
 0x29e   : > { %1153 = sbr.rel (%p1440_p12) target bundleno = 686 (0x2ae), region = 52 }
 0x2a3   : > { %v1154_v10 = vld [vmem:[#allocation2 + $0x30] sm:$0xff]  ;;  %v1155_v59 = vld [vmem:[#allocation2] sm:$0xff]  ;;  %v1156_v6 = vld [vmem:[#allocation2 + $0x58] sm:$0xff] }
 0x2a4   : > { %v1170_v7 = vadd.f32 %v2627_v19, %v1154_v10  ;;  %v1171_v45 = vadd.f32 %v2629_v38, %v1155_v59  ;;  %v1172_v2 = vadd.f32 %v2631_v11, %v1156_v6  ;;  %v1157_v51 = vld [vmem:[#allocation2 + $0x18] sm:$0xff]  ;;  %v1158_v48 = vld [vmem:[#allocation2 + $0x50] sm:$0xff]  ;;  %v1159_v24 = vld [vmem:[#allocation2 + $0x68] sm:$0xff] }
 0x2a5   : > { %v1173_v49 = vadd.f32 %v2633_v23, %v1157_v51  ;;  %v1174_v13 = vadd.f32 %v2635_v44, %v1158_v48  ;;  %v1175_v8 = vadd.f32 %v2637_v39, %v1159_v24  ;;  %v1160_v0 = vld [vmem:[#allocation2 + $0x8] sm:$0xff]  ;;  %v1162_v31 = vld [vmem:[#allocation2 + $0x40] sm:$0xff]  ;;  %v1164_v58 = vld [vmem:[#allocation2 + $0x10] sm:$0xff] }
 0x2a6   : > { %v1161_v12 = vld [vmem:[#allocation2 + $0x48] sm:$0xff]  ;;  %1186 = vst [vmem:[#allocation2 + $0x30] sm:$0xff] %v1170_v7  ;;  %1187 = vst [vmem:[#allocation2] sm:$0xff] %v1171_v45  ;;  %v1176_v20 = vadd.f32 %v2639_v34, %v1160_v0  ;;  %v1178_v5 = vadd.f32 %v2643_v22, %v1162_v31  ;;  %v1163_v19 = vld [vmem:[#allocation2 + $0x20] sm:$0xff]  ;;  %v1180_v27 = vadd.f32 %v2647_v29, %v1164_v58 }
 0x2a7   : > { %1188 = vst [vmem:[#allocation2 + $0x58] sm:$0xff] %v1172_v2  ;;  %v1177_v14 = vadd.f32 %v2641_v37, %v1161_v12  ;;  %v1165_v21 = vld [vmem:[#allocation2 + $0x38] sm:$0xff]  ;;  %1189 = vst [vmem:[#allocation2 + $0x18] sm:$0xff] %v1173_v49  ;;  %v1179_v38 = vadd.f32 %v2645_v54, %v1163_v19  ;;  %v1166_v11 = vld [vmem:[#allocation2 + $0x60] sm:$0xff] }
 0x2a8   : > { %1190 = vst [vmem:[#allocation2 + $0x50] sm:$0xff] %v1174_v13  ;;  %1191 = vst [vmem:[#allocation2 + $0x68] sm:$0xff] %v1175_v8  ;;  %v1181_v53 = vadd.f32 %v2649_v41, %v1165_v21  ;;  %v1167_v25 = vld [vmem:[#allocation2 + $0x70] sm:$0xff]  ;;  %v1168_v15 = vld [vmem:[#allocation2 + $0x78] sm:$0xff]  ;;  %v1182_v23 = vadd.f32 %v2651_v55, %v1166_v11 }
 0x2a9   : > { %1192 = vst [vmem:[#allocation2 + $0x8] sm:$0xff] %v1176_v20  ;;  %1193 = vst [vmem:[#allocation2 + $0x48] sm:$0xff] %v1177_v14  ;;  %v1183_v33 = vadd.f32 %v2653_v63, %v1167_v25  ;;  %v1184_v26 = vadd.f32 %v2655_v4, %v1168_v15  ;;  %v1169_v44 = vld [vmem:[#allocation2 + $0x28] sm:$0xff] }
 0x2aa   : > { %1194 = vst [vmem:[#allocation2 + $0x40] sm:$0xff] %v1178_v5  ;;  %1195 = vst [vmem:[#allocation2 + $0x20] sm:$0xff] %v1179_v38  ;;  %v1185_v52 = vadd.f32 %v2657_v17, %v1169_v44 }
 0x2ab   : > { %1196 = vst [vmem:[#allocation2 + $0x10] sm:$0xff] %v1180_v27  ;;  %1197 = vst [vmem:[#allocation2 + $0x38] sm:$0xff] %v1181_v53 }
 0x2ac   : > { %1198 = vst [vmem:[#allocation2 + $0x60] sm:$0xff] %v1182_v23  ;;  %1199 = vst [vmem:[#allocation2 + $0x70] sm:$0xff] %v1183_v33 }
 0x2ad   : > { %1200 = vst [vmem:[#allocation2 + $0x78] sm:$0xff] %v1184_v26  ;;  %1201 = vst [vmem:[#allocation2 + $0x28] sm:$0xff] %v1185_v52 }
 0x2ae PF: > { %p1441_p13 = scmp.ne.s32.totalorder %s1989_s18, 1 }
 0x2b0   : > { %1205 = sbr.rel (%p1441_p13) target bundleno = 702 (0x2be), region = 56 }
 0x2b5   : > { %v1206_v28 = vld [vmem:[#allocation2 + $0x30] sm:$0xff]  ;;  %v1207_v39 = vld [vmem:[#allocation2] sm:$0xff]  ;;  %v1208_v30 = vld [vmem:[#allocation2 + $0x58] sm:$0xff] }
 0x2b6   : > { %1222 = vst [vmem:[%s2661_s9] sm:$0xff] %v1206_v28  ;;  %1223 = vst [vmem:[%s2661_s9 + $0x8] sm:$0xff] %v1207_v39  ;;  %v1209_v60 = vld [vmem:[#allocation2 + $0x18] sm:$0xff]  ;;  %v1210_v34 = vld [vmem:[#allocation2 + $0x50] sm:$0xff] }
 0x2b7   : > { %1224 = vst [vmem:[%s2661_s9 + $0x10] sm:$0xff] %v1208_v30  ;;  %v1211_v62 = vld [vmem:[#allocation2 + $0x68] sm:$0xff]  ;;  %1225 = vst [vmem:[%s2661_s9 + $0x18] sm:$0xff] %v1209_v60  ;;  %v1214_v50 = vld [vmem:[#allocation2 + $0x40] sm:$0xff] }
 0x2b8   : > { %1226 = vst [vmem:[%s2661_s9 + $0x20] sm:$0xff] %v1210_v34  ;;  %1227 = vst [vmem:[%s2661_s9 + $0x28] sm:$0xff] %v1211_v62  ;;  %v1212_v36 = vld [vmem:[#allocation2 + $0x8] sm:$0xff]  ;;  %v1215_v16 = vld [vmem:[#allocation2 + $0x20] sm:$0xff] }
 0x2b9   : > { %v1213_v37 = vld [vmem:[#allocation2 + $0x48] sm:$0xff]  ;;  %1228 = vst [vmem:[%s2661_s9 + $0x30] sm:$0xff] %v1212_v36  ;;  %1230 = vst [vmem:[%s2661_s9 + $0x40] sm:$0xff] %v1214_v50  ;;  %v1216_v22 = vld [vmem:[#allocation2 + $0x10] sm:$0xff] }
 0x2ba   : > { %1229 = vst [vmem:[%s2661_s9 + $0x38] sm:$0xff] %v1213_v37  ;;  %v1217_v32 = vld [vmem:[#allocation2 + $0x38] sm:$0xff]  ;;  %1231 = vst [vmem:[%s2661_s9 + $0x48] sm:$0xff] %v1215_v16  ;;  %v1218_v56 = vld [vmem:[#allocation2 + $0x60] sm:$0xff] }
 0x2bb   : > { %1232 = vst [vmem:[%s2661_s9 + $0x50] sm:$0xff] %v1216_v22  ;;  %1233 = vst [vmem:[%s2661_s9 + $0x58] sm:$0xff] %v1217_v32  ;;  %v1219_v54 = vld [vmem:[#allocation2 + $0x70] sm:$0xff]  ;;  %v1220_v3 = vld [vmem:[#allocation2 + $0x78] sm:$0xff] }
 0x2bc   : > { %1234 = vst [vmem:[%s2661_s9 + $0x60] sm:$0xff] %v1218_v56  ;;  %1235 = vst [vmem:[%s2661_s9 + $0x68] sm:$0xff] %v1219_v54  ;;  %v1221_v40 = vld [vmem:[#allocation2 + $0x28] sm:$0xff] }
 0x2bd   : > { %1236 = vst [vmem:[%s2661_s9 + $0x70] sm:$0xff] %v1220_v3  ;;  %1237 = vst [vmem:[%s2661_s9 + $0x78] sm:$0xff] %v1221_v40 }
 0x2be PF: > { %s1239_s18 = scalar_lea.sflag [#allocation5], %s2238_s11  ;;  %p2825_p8 = scmp.ne.s32.totalorder %s2820_s10, 0 }
 0x2bf   : > { %s1443_s17 = sshll.u32 (%p2825_p8), %s1993_s19, 4 }
 0x2c0   : > { %1245 = sbr.rel (!%p2825_p8) target bundleno = 737 (0x2e1), region = 60  ;;  %s1247_s25 = ssub.s32 (%p2825_p8), 30, %s1443_s17 }
 0x2c1   : > { %p1248_p2 = scmp.lt.s32.totalorder (%p2825_p8), %s1247_s25, 16 }
 0x2c5   : > { %s2852_s25 = smov (!%p1248_p2, %s1247_s25), 16 }
 0x2c6   : > { %s2718_s7 = sshll.u32 %s2852_s25, 7 }
 0x2c7   : > { %s1252_s28 = ssub.s32 2048, %s2718_s7 }
 0x2c8   : > { %1253 = vsyncadd %s1239_s18, %s1252_s28  ;;  %p1445_p1 = scmp.ne.s32.totalorder %s2718_s7, 0  ;;  %s1454_s10 = sshll.u32 %s1993_s19, 11 }
 0x2c9   : > { %s2826_s24 = sld [smem:[#allocation22_spill]]  ;;  %s1258_s15 = sshll.u32 %s2661_s9, 4  ;;  %s2731_s15 = int_to_ptr.vmem [resolvable:$true] %s1258_s15 }
 0x2ca   : > { %s1881_s29 = scalar_lea.vmem %s2731_s15, %s2718_s7  ;;  %s2017_s6 = smov [#allocation9]  }
 0x2cb   : > { %p1882_p6 = scmp.ne.s32.totalorder %s2731_s15, %s1881_s29  ;;  %s1885_s21 = sshll.u32 %s2017_s6, 4  ;;  %s1886_s21 = int_to_ptr.vmem [resolvable:$false] %s1885_s21 }
 0x2cc   : > { %s1887_s19 = scalar_lea.vmem %s1886_s21, 4096  ;;  %p1888_p10 = scmp.lt.s32.totalorder %s2731_s15, %s1886_s21 }
 0x2cd   : > { %p1883_p9 = pnand %p1882_p6, %p1445_p1  ;;  %p1889_p3 = scmp.lt.s32.totalorder %s1887_s19, %s1881_s29 }
 0x2cf   : > { %s2728_s0 = scalar_lea.hbm %s2826_s24, %s1454_s10  ;;  %p1884_p4 = pneg %p1883_p9 }
 0x2d0   : > { %p1890_p11 = por %p1889_p3, %p1888_p10 }
 0x2d2   : > { %p1891_p0 = pnand %p1890_p11, %p1884_p4 }
 0x2d4   : > { %1894 = shalt.err (!%p1891_p0)
}
 0x2d5   : > { %s1895_s3 = scalar_lea.hbm %s2728_s0, %s2718_s7  ;;  %s1899_s27 = scalar_lea.hbm %s2826_s24, 3840 }
 0x2d6   : > { %p1896_p5 = scmp.ne.s32.totalorder %s2728_s0, %s1895_s3  ;;  %p1900_p13 = scmp.lt.s32.totalorder %s2728_s0, %s2826_s24 }
 0x2d7   : > { %p1901_p8 = scmp.lt.s32.totalorder %s1899_s27, %s1895_s3 }
 0x2d8   : > { %p1897_p7 = pnand %p1896_p5, %p1445_p1 }
 0x2d9   : > { %p1902_p2 = por %p1901_p8, %p1900_p13 }
 0x2da   : > { %p1898_p12 = pneg %p1897_p7 }
 0x2dc   : > { %p1903_p6 = pnand %p1902_p2, %p1898_p12 }
 0x2de   : > { %1906 = shalt.err (!%p1903_p6)
}
 0x2df   : > { %s2018_s4 = smov 128   ;;  %s2019_s9 = smov 8  }
 0x2e0   : > { %1264 = dma.vmem_to_hbm [thread:$0]  (%p1445_p1), %s2731_s15, %s2718_s7, %s2728_s0, %s1239_s18, %s2018_s4, %s2018_s4, %s2019_s9  }
 0x2e1 PF: > { %s2827_s17 = sld [smem:[#allocation13_spill]]  ;;  %p1577_p9 = scmp.ge.s32.totalorder %s2005_s22, 2 }
 0x2e2   : > { %s2828_s25 = sld [smem:[#allocation20_spill]] }
 0x2e7   : > { %s1273_s28 = sand.u32 1, %s2827_s17  }
 0x2e8   : > { %p2829_p4 = scmp.ne.s32.totalorder %s2828_s25, 0  ;;  %s1274_s10 = scalar_lea.sflag [#allocation5], %s1273_s28 }
 0x2ea   : > { %p1574_p10 = pnand %p1577_p9, %p2829_p4 }
 0x2ec   : > { %p1575_p3 = pneg %p1574_p10 }
 0x2ee   : > { %1960 = dma.done.wait (%p1575_p3), %s1274_s10, 2048  }
 0x2ef   : > { %1962 = vsyncadd (%p1575_p3), %s1274_s10, 4294965248  ;;  %s22_s22 = sadd.s32 1, %s2005_s22   ;;  %s2830_s11 = sld [smem:[#allocation18_spill]] }
 0x2f0   : > { %p19_p11 = scmp.ge.s32.totalorder %s22_s22, 6   ;;  %s2831_s18 = sld [smem:[#allocation14_spill]] }
 0x2f1   : > { %s2832_s17 = sld [smem:[#allocation19_spill]]  ;;  %s2836_s12 = smov %s1969_s13 }
 0x2f2   : > { %s2833_s19 = sld [smem:[#allocation15_spill]]  ;;  %s2837_s13 = smov %s1973_s14 }
 0x2f3   : > { %s2834_s7 = sld [smem:[#allocation16_spill]]  ;;  %s2839_s15 = smov %s1981_s16 }
 0x2f4   : > { %s2835_s21 = sld [smem:[#allocation17_spill]] }
 0x2f5   : > { %s2838_s14 = smov %s2830_s11  ;;  %21 = sbr.rel (!%p19_p11) target bundleno = 14 (0xe), region = 113 }
 0x2f6   : > { %s2840_s16 = smov %s2831_s18  ;;  %s2841_s18 = smov %s1997_s20 }
 0x2f9   : > { %s2842_s20 = smov %s2834_s7 }
 0x2fa   :  { %1279 = vsyncpa [#allocation4], 1 }
 0x2fb   :  { %1281 = vsyncpa [#allocation4 + $0x1], 1 }
 0x2fc   :  { %1282 = vsyncpa [#allocation7], 1 }
 0x2fd   :  { %1284 = vsyncpa [#allocation7 + $0x1], 1 }
 0x2fe   :  { %1285 = vsyncpa [#allocation5], 1 }
 0x2ff   :  { %1287 = vsyncpa [#allocation5 + $0x1], 1 }

</bundles_post_ra>
